<compile_context>
chip_gen: v5e
topology: v5e:2x2
jax: 0.10.0
libtpu: 0.0.40
codegen_flags: <defaults>
</compile_context>

<pallas_src>
import functools

import jax
import jax.numpy as jnp
from jax import lax
from jax.experimental import pallas as pl
from jax.experimental.pallas import tpu as pltpu

GRID = 10          # number of spline sections (module default)
K = 3              # Cox-de Boor degree (module default)
INPUT_DIM = 5      # module default
SIZE = GRID + 1 + (K - 1)   # = 13 coefficients per dimension


def _round_up(a, b):
    return -(-a // b) * b


def _make_knots(grid, k):
    """Extended knot vector (identical for every input dimension).

    Reproduces make_grid(linspace(-1, 1, grid+1)) followed by extend_grid
    (prepend/append k knots with spacing h = 2/grid)."""
    h = 2.0 / grid
    n_knots = grid + 1 + 2 * k          # 17 for grid=10, k=3
    return [float(-1.0 + (j - k) * h) for j in range(n_knots)]


def _make_spline_kernel(knots, k, num_basis, chunk, tile_n):
    """Build the Pallas kernel. All arguments are compile-time constants."""
    n_knots = len(knots)
    # Reciprocals of the knot differences, precomputed per Cox-de Boor level.
    inv = {
        kk: [1.0 / (knots[i + kk] - knots[i]) for i in range(n_knots - kk)]
        for kk in range(1, k + 1)
    }
    num_chunks = tile_n // chunk

    def kernel(x_ref, coef_ref, o_ref):
        # Per-dimension coefficient columns, hoisted out of the chunk loop.
        c = coef_ref[...]                                        # (D, S)
        c_cols = [c[:, i][:, None] for i in range(num_basis)]    # each (D, 1)

        def body(cidx, carry):
            start = pl.multiple_of(cidx * chunk, chunk)
            x = x_ref[:, pl.ds(start, chunk)]                    # (D, chunk) f32

            # Degree-0 basis as step-function differences:
            #   B0_j = [x >= t_j] - [x >= t_{j+1}] == [t_j <= x < t_{j+1}]
            steps = [(x >= knots[j]).astype(jnp.float32)
                     for j in range(n_knots)]
            B = [steps[j] - steps[j + 1] for j in range(n_knots - 1)]

            # Cox-de Boor recursion, fully unrolled; shared weights, no divides:
            #   w_i       = (x - t_i) * 1/(t_{i+kk} - t_i)
            #   B_new[i]  = w_i * B[i] + (1 - w_{i+1}) * B[i+1]
            for kk in range(1, k + 1):
                new_B = []
                w_prev = (x - knots[0]) * inv[kk][0]
                for i in range(len(B) - 1):
                    w_next = (x - knots[i + 1]) * inv[kk][i + 1]
                    new_B.append(w_prev * B[i] + (1.0 - w_next) * B[i + 1])
                    w_prev = w_next
                B = new_B                                       # num_basis terms at end

            # out[d, n] = sum_i coef[d, i] * B_i(x[d, n])   ('ij,ijk->ik')
            acc = c_cols[0] * B[0]
            for i in range(1, num_basis):
                acc = acc + c_cols[i] * B[i]
            o_ref[:, pl.ds(start, chunk)] = acc
            return carry

        lax.fori_loop(0, num_chunks, body, 0, unroll=True)

    return kernel


@functools.partial(jax.jit,
                   static_argnames=("grid", "k", "max_tile_n", "chunk"))
def spline_activation_forward_dn(x_t, coef, *, grid=GRID, k=K,
                                 max_tile_n=2048, chunk=256):
    """Transposed-layout entry point: x_t (D, N) float32 -> (D, N) float32.

    Call this directly if the surrounding model already keeps activations in
    (input_dim, n_samples) layout — it avoids the wrapper transposes."""
    d, n = x_t.shape
    size = grid + 1 + (k - 1)
    assert coef.shape == (d, size)
    assert chunk % 128 == 0 and max_tile_n % chunk == 0

    # Lane-dense tiling: pad N up so tile_n | n_pad. Padded samples are zeros
    # (inside the spline support) and are sliced off before returning.
    n_pad = _round_up(max(n, chunk), chunk)
    tile_n = min(max_tile_n, n_pad)
    n_pad = _round_up(n_pad, tile_n)
    if n_pad != n:
        x_t = jnp.pad(x_t, ((0, 0), (0, n_pad - n)))

    knots = _make_knots(grid, k)
    kernel = _make_spline_kernel(knots, k, size, chunk, tile_n)

    out_t = pl.pallas_call(
        kernel,
        out_shape=jax.ShapeDtypeStruct((d, n_pad), x_t.dtype),
        grid_spec=pltpu.PrefetchScalarGridSpec(
            num_scalar_prefetch=0,
            grid=(n_pad // tile_n,),
            in_specs=[
                pl.BlockSpec((d, tile_n), lambda i: (0, i)),   # x_t tile
                pl.BlockSpec((d, size), lambda i: (0, 0)),     # coef (resident)
            ],
            out_specs=pl.BlockSpec((d, tile_n), lambda i: (0, i)),
        ),
        compiler_params=pltpu.CompilerParams(
            dimension_semantics=("parallel",)),
    )(x_t, coef)
    return out_t[:, :n]


@functools.partial(jax.jit,
                   static_argnames=("grid", "k", "max_tile_n", "chunk"))
def spline_activation_forward(x, coef, *, grid=GRID, k=K,
                              max_tile_n=2048, chunk=256):
    """Public interface matching the nn.Module: x (N, D) -> (N, D)."""
    # TODO(synk): the two transposes below are standalone XLA passes over the
    # data; if possible keep the (D, N) layout in the surrounding model and
    # call spline_activation_forward_dn directly to avoid them.
    out_t = spline_activation_forward_dn(
        x.T, coef, grid=grid, k=k, max_tile_n=max_tile_n, chunk=chunk)
    return out_t.T


def spline_activation_reference(x, coef, grid=GRID, k=K):
    """Pure-JAX mirror of the PyTorch forward, for correctness checking."""
    t = jnp.asarray(_make_knots(grid, k), dtype=jnp.float32)
    xt = x.T                                            # (D, N)
    B = ((xt[:, None, :] >= t[None, :-1, None])
         & (xt[:, None, :] < t[None, 1:, None])).astype(jnp.float32)
    for kk in range(1, k + 1):
        B = ((xt[:, None, :] - t[None, :-(kk + 1), None])
             / (t[kk:-1] - t[:-(kk + 1)])[None, :, None] * B[:, :-1, :]
             + (t[None, kk + 1:, None] - xt[:, None, :])
             / (t[kk + 1:] - t[1:-kk])[None, :, None] * B[:, 1:, :])
    out = jnp.einsum("ij,ijk->ik", coef, B)
    return out.T


if __name__ == "__main__":
    key = jax.random.PRNGKey(0)
    kx, kc, kx2 = jax.random.split(key, 3)

    n_samples, input_dim = 256, INPUT_DIM
    # activations in [-1, 1] (the spline's support)
    x = jax.random.uniform(kx, (n_samples, input_dim), jnp.float32,
                           minval=-1.0, maxval=1.0)
    # torch.rand -> uniform [0, 1), deterministic here via PRNGKey(0)
    coef = jax.random.uniform(kc, (input_dim, SIZE), jnp.float32)

    out = spline_activation_forward(x, coef)
    jax.block_until_ready(out)

    ref = spline_activation_reference(x, coef)
    assert out.shape == (n_samples, input_dim)
    assert jnp.allclose(out, ref, atol=1e-5, rtol=1e-5), "mismatch vs reference"

    # Ragged N (not a multiple of the tile/chunk) exercises the padding path.
    x2 = jax.random.uniform(kx2, (300, input_dim), jnp.float32,
                            minval=-1.0, maxval=1.0)
    out2 = spline_activation_forward(x2, coef)
    jax.block_until_ready(out2)
    ref2 = spline_activation_reference(x2, coef)
    assert out2.shape == (300, input_dim)
    assert jnp.allclose(out2, ref2, atol=1e-5, rtol=1e-5), "ragged mismatch"

    print("KERNEL_OK")
</pallas_src>

<mosaic_0001>
module attributes {stable_mosaic.version = 11 : i64} {
  func.func @kernel(%arg0: i32, %arg1: memref<5x256xf32, #tpu.memory_space<vmem>>, %arg2: memref<5x13xf32, #tpu.memory_space<vmem>>, %arg3: memref<5x256xf32, #tpu.memory_space<vmem>>) attributes {dimension_semantics = [#tpu.dimension_semantics<parallel>], iteration_bounds = array<i64: 1>, scalar_prefetch = 0 : i64, scratch_operands = 0 : i64, tpu.core_type = #tpu.core_type<tc>, window_params = [{transform_indices = @transform_0, window_bounds = array<i64: 5, 256>}, {pipeline_mode = #tpu.pipeline_mode<synchronous>, transform_indices = @transform_1, window_bounds = array<i64: 5, 13>}, {transform_indices = @transform_2, window_bounds = array<i64: 5, 256>}]} {
    %c0 = arith.constant 0 : index
    %c0_0 = arith.constant 0 : index
    %0 = vector.load %arg2[%c0, %c0_0] : memref<5x13xf32, #tpu.memory_space<vmem>>, vector<5x13xf32>
    %1 = vector.extract_strided_slice %0 {offsets = [0, 0], sizes = [5, 1], strides = [1, 1]} : vector<5x13xf32> to vector<5x1xf32>
    %2 = vector.shape_cast %1 : vector<5x1xf32> to vector<5xf32>
    %3 = vector.shape_cast %2 : vector<5xf32> to vector<5x1xf32>
    %4 = vector.extract_strided_slice %0 {offsets = [0, 1], sizes = [5, 1], strides = [1, 1]} : vector<5x13xf32> to vector<5x1xf32>
    %5 = vector.shape_cast %4 : vector<5x1xf32> to vector<5xf32>
    %6 = vector.shape_cast %5 : vector<5xf32> to vector<5x1xf32>
    %7 = vector.extract_strided_slice %0 {offsets = [0, 2], sizes = [5, 1], strides = [1, 1]} : vector<5x13xf32> to vector<5x1xf32>
    %8 = vector.shape_cast %7 : vector<5x1xf32> to vector<5xf32>
    %9 = vector.shape_cast %8 : vector<5xf32> to vector<5x1xf32>
    %10 = vector.extract_strided_slice %0 {offsets = [0, 3], sizes = [5, 1], strides = [1, 1]} : vector<5x13xf32> to vector<5x1xf32>
    %11 = vector.shape_cast %10 : vector<5x1xf32> to vector<5xf32>
    %12 = vector.shape_cast %11 : vector<5xf32> to vector<5x1xf32>
    %13 = vector.extract_strided_slice %0 {offsets = [0, 4], sizes = [5, 1], strides = [1, 1]} : vector<5x13xf32> to vector<5x1xf32>
    %14 = vector.shape_cast %13 : vector<5x1xf32> to vector<5xf32>
    %15 = vector.shape_cast %14 : vector<5xf32> to vector<5x1xf32>
    %16 = vector.extract_strided_slice %0 {offsets = [0, 5], sizes = [5, 1], strides = [1, 1]} : vector<5x13xf32> to vector<5x1xf32>
    %17 = vector.shape_cast %16 : vector<5x1xf32> to vector<5xf32>
    %18 = vector.shape_cast %17 : vector<5xf32> to vector<5x1xf32>
    %19 = vector.extract_strided_slice %0 {offsets = [0, 6], sizes = [5, 1], strides = [1, 1]} : vector<5x13xf32> to vector<5x1xf32>
    %20 = vector.shape_cast %19 : vector<5x1xf32> to vector<5xf32>
    %21 = vector.shape_cast %20 : vector<5xf32> to vector<5x1xf32>
    %22 = vector.extract_strided_slice %0 {offsets = [0, 7], sizes = [5, 1], strides = [1, 1]} : vector<5x13xf32> to vector<5x1xf32>
    %23 = vector.shape_cast %22 : vector<5x1xf32> to vector<5xf32>
    %24 = vector.shape_cast %23 : vector<5xf32> to vector<5x1xf32>
    %25 = vector.extract_strided_slice %0 {offsets = [0, 8], sizes = [5, 1], strides = [1, 1]} : vector<5x13xf32> to vector<5x1xf32>
    %26 = vector.shape_cast %25 : vector<5x1xf32> to vector<5xf32>
    %27 = vector.shape_cast %26 : vector<5xf32> to vector<5x1xf32>
    %28 = vector.extract_strided_slice %0 {offsets = [0, 9], sizes = [5, 1], strides = [1, 1]} : vector<5x13xf32> to vector<5x1xf32>
    %29 = vector.shape_cast %28 : vector<5x1xf32> to vector<5xf32>
    %30 = vector.shape_cast %29 : vector<5xf32> to vector<5x1xf32>
    %31 = vector.extract_strided_slice %0 {offsets = [0, 10], sizes = [5, 1], strides = [1, 1]} : vector<5x13xf32> to vector<5x1xf32>
    %32 = vector.shape_cast %31 : vector<5x1xf32> to vector<5xf32>
    %33 = vector.shape_cast %32 : vector<5xf32> to vector<5x1xf32>
    %34 = vector.extract_strided_slice %0 {offsets = [0, 11], sizes = [5, 1], strides = [1, 1]} : vector<5x13xf32> to vector<5x1xf32>
    %35 = vector.shape_cast %34 : vector<5x1xf32> to vector<5xf32>
    %36 = vector.shape_cast %35 : vector<5xf32> to vector<5x1xf32>
    %37 = vector.extract_strided_slice %0 {offsets = [0, 12], sizes = [5, 1], strides = [1, 1]} : vector<5x13xf32> to vector<5x1xf32>
    %38 = vector.shape_cast %37 : vector<5x1xf32> to vector<5xf32>
    %39 = vector.shape_cast %38 : vector<5xf32> to vector<5x1xf32>
    %c0_i32 = arith.constant 0 : i32
    %c256_i32 = arith.constant 256 : i32
    %40 = arith.muli %c0_i32, %c256_i32 : i32
    %41 = tpu.assume_multiple %40, 256 : i32
    %c0_1 = arith.constant 0 : index
    %42 = arith.index_cast %41 : i32 to index
    %43 = vector.load %arg1[%c0_1, %42] : memref<5x256xf32, #tpu.memory_space<vmem>>, vector<5x256xf32>
    %cst = arith.constant -1.600000e+00 : f32
    %44 = vector.broadcast %cst : f32 to vector<5x256xf32>
    %45 = arith.cmpf oge, %43, %44 : vector<5x256xf32>
    %46 = arith.extui %45 : vector<5x256xi1> to vector<5x256xi32>
    %47 = arith.sitofp %46 : vector<5x256xi32> to vector<5x256xf32>
    %cst_2 = arith.constant -1.400000e+00 : f32
    %48 = vector.broadcast %cst_2 : f32 to vector<5x256xf32>
    %49 = arith.cmpf oge, %43, %48 : vector<5x256xf32>
    %50 = arith.extui %49 : vector<5x256xi1> to vector<5x256xi32>
    %51 = arith.sitofp %50 : vector<5x256xi32> to vector<5x256xf32>
    %cst_3 = arith.constant -1.200000e+00 : f32
    %52 = vector.broadcast %cst_3 : f32 to vector<5x256xf32>
    %53 = arith.cmpf oge, %43, %52 : vector<5x256xf32>
    %54 = arith.extui %53 : vector<5x256xi1> to vector<5x256xi32>
    %55 = arith.sitofp %54 : vector<5x256xi32> to vector<5x256xf32>
    %cst_4 = arith.constant -1.000000e+00 : f32
    %56 = vector.broadcast %cst_4 : f32 to vector<5x256xf32>
    %57 = arith.cmpf oge, %43, %56 : vector<5x256xf32>
    %58 = arith.extui %57 : vector<5x256xi1> to vector<5x256xi32>
    %59 = arith.sitofp %58 : vector<5x256xi32> to vector<5x256xf32>
    %cst_5 = arith.constant -8.000000e-01 : f32
    %60 = vector.broadcast %cst_5 : f32 to vector<5x256xf32>
    %61 = arith.cmpf oge, %43, %60 : vector<5x256xf32>
    %62 = arith.extui %61 : vector<5x256xi1> to vector<5x256xi32>
    %63 = arith.sitofp %62 : vector<5x256xi32> to vector<5x256xf32>
    %cst_6 = arith.constant -6.000000e-01 : f32
    %64 = vector.broadcast %cst_6 : f32 to vector<5x256xf32>
    %65 = arith.cmpf oge, %43, %64 : vector<5x256xf32>
    %66 = arith.extui %65 : vector<5x256xi1> to vector<5x256xi32>
    %67 = arith.sitofp %66 : vector<5x256xi32> to vector<5x256xf32>
    %cst_7 = arith.constant -4.000000e-01 : f32
    %68 = vector.broadcast %cst_7 : f32 to vector<5x256xf32>
    %69 = arith.cmpf oge, %43, %68 : vector<5x256xf32>
    %70 = arith.extui %69 : vector<5x256xi1> to vector<5x256xi32>
    %71 = arith.sitofp %70 : vector<5x256xi32> to vector<5x256xf32>
    %cst_8 = arith.constant -2.000000e-01 : f32
    %72 = vector.broadcast %cst_8 : f32 to vector<5x256xf32>
    %73 = arith.cmpf oge, %43, %72 : vector<5x256xf32>
    %74 = arith.extui %73 : vector<5x256xi1> to vector<5x256xi32>
    %75 = arith.sitofp %74 : vector<5x256xi32> to vector<5x256xf32>
    %cst_9 = arith.constant 0.000000e+00 : f32
    %76 = vector.broadcast %cst_9 : f32 to vector<5x256xf32>
    %77 = arith.cmpf oge, %43, %76 : vector<5x256xf32>
    %78 = arith.extui %77 : vector<5x256xi1> to vector<5x256xi32>
    %79 = arith.sitofp %78 : vector<5x256xi32> to vector<5x256xf32>
    %cst_10 = arith.constant 2.000000e-01 : f32
    %80 = vector.broadcast %cst_10 : f32 to vector<5x256xf32>
    %81 = arith.cmpf oge, %43, %80 : vector<5x256xf32>
    %82 = arith.extui %81 : vector<5x256xi1> to vector<5x256xi32>
    %83 = arith.sitofp %82 : vector<5x256xi32> to vector<5x256xf32>
    %cst_11 = arith.constant 4.000000e-01 : f32
    %84 = vector.broadcast %cst_11 : f32 to vector<5x256xf32>
    %85 = arith.cmpf oge, %43, %84 : vector<5x256xf32>
    %86 = arith.extui %85 : vector<5x256xi1> to vector<5x256xi32>
    %87 = arith.sitofp %86 : vector<5x256xi32> to vector<5x256xf32>
    %cst_12 = arith.constant 6.000000e-01 : f32
    %88 = vector.broadcast %cst_12 : f32 to vector<5x256xf32>
    %89 = arith.cmpf oge, %43, %88 : vector<5x256xf32>
    %90 = arith.extui %89 : vector<5x256xi1> to vector<5x256xi32>
    %91 = arith.sitofp %90 : vector<5x256xi32> to vector<5x256xf32>
    %cst_13 = arith.constant 8.000000e-01 : f32
    %92 = vector.broadcast %cst_13 : f32 to vector<5x256xf32>
    %93 = arith.cmpf oge, %43, %92 : vector<5x256xf32>
    %94 = arith.extui %93 : vector<5x256xi1> to vector<5x256xi32>
    %95 = arith.sitofp %94 : vector<5x256xi32> to vector<5x256xf32>
    %cst_14 = arith.constant 1.000000e+00 : f32
    %96 = vector.broadcast %cst_14 : f32 to vector<5x256xf32>
    %97 = arith.cmpf oge, %43, %96 : vector<5x256xf32>
    %98 = arith.extui %97 : vector<5x256xi1> to vector<5x256xi32>
    %99 = arith.sitofp %98 : vector<5x256xi32> to vector<5x256xf32>
    %cst_15 = arith.constant 1.200000e+00 : f32
    %100 = vector.broadcast %cst_15 : f32 to vector<5x256xf32>
    %101 = arith.cmpf oge, %43, %100 : vector<5x256xf32>
    %102 = arith.extui %101 : vector<5x256xi1> to vector<5x256xi32>
    %103 = arith.sitofp %102 : vector<5x256xi32> to vector<5x256xf32>
    %cst_16 = arith.constant 1.400000e+00 : f32
    %104 = vector.broadcast %cst_16 : f32 to vector<5x256xf32>
    %105 = arith.cmpf oge, %43, %104 : vector<5x256xf32>
    %106 = arith.extui %105 : vector<5x256xi1> to vector<5x256xi32>
    %107 = arith.sitofp %106 : vector<5x256xi32> to vector<5x256xf32>
    %cst_17 = arith.constant 1.600000e+00 : f32
    %108 = vector.broadcast %cst_17 : f32 to vector<5x256xf32>
    %109 = arith.cmpf oge, %43, %108 : vector<5x256xf32>
    %110 = arith.extui %109 : vector<5x256xi1> to vector<5x256xi32>
    %111 = arith.sitofp %110 : vector<5x256xi32> to vector<5x256xf32>
    %112 = arith.subf %47, %51 : vector<5x256xf32>
    %113 = arith.subf %51, %55 : vector<5x256xf32>
    %114 = arith.subf %55, %59 : vector<5x256xf32>
    %115 = arith.subf %59, %63 : vector<5x256xf32>
    %116 = arith.subf %63, %67 : vector<5x256xf32>
    %117 = arith.subf %67, %71 : vector<5x256xf32>
    %118 = arith.subf %71, %75 : vector<5x256xf32>
    %119 = arith.subf %75, %79 : vector<5x256xf32>
    %120 = arith.subf %79, %83 : vector<5x256xf32>
    %121 = arith.subf %83, %87 : vector<5x256xf32>
    %122 = arith.subf %87, %91 : vector<5x256xf32>
    %123 = arith.subf %91, %95 : vector<5x256xf32>
    %124 = arith.subf %95, %99 : vector<5x256xf32>
    %125 = arith.subf %99, %103 : vector<5x256xf32>
    %126 = arith.subf %103, %107 : vector<5x256xf32>
    %127 = arith.subf %107, %111 : vector<5x256xf32>
    %cst_18 = arith.constant -1.600000e+00 : f32
    %128 = vector.broadcast %cst_18 : f32 to vector<5x256xf32>
    %129 = arith.subf %43, %128 : vector<5x256xf32>
    %cst_19 = arith.constant 5.000000e+00 : f32
    %130 = vector.broadcast %cst_19 : f32 to vector<5x256xf32>
    %131 = arith.mulf %129, %130 : vector<5x256xf32>
    %cst_20 = arith.constant -1.400000e+00 : f32
    %132 = vector.broadcast %cst_20 : f32 to vector<5x256xf32>
    %133 = arith.subf %43, %132 : vector<5x256xf32>
    %cst_21 = arith.constant 5.000000e+00 : f32
    %134 = vector.broadcast %cst_21 : f32 to vector<5x256xf32>
    %135 = arith.mulf %133, %134 : vector<5x256xf32>
    %136 = arith.mulf %131, %112 : vector<5x256xf32>
    %cst_22 = arith.constant 1.000000e+00 : f32
    %137 = vector.broadcast %cst_22 : f32 to vector<5x256xf32>
    %138 = arith.subf %137, %135 : vector<5x256xf32>
    %139 = arith.mulf %138, %113 : vector<5x256xf32>
    %140 = arith.addf %136, %139 : vector<5x256xf32>
    %cst_23 = arith.constant -1.200000e+00 : f32
    %141 = vector.broadcast %cst_23 : f32 to vector<5x256xf32>
    %142 = arith.subf %43, %141 : vector<5x256xf32>
    %cst_24 = arith.constant 5.000000e+00 : f32
    %143 = vector.broadcast %cst_24 : f32 to vector<5x256xf32>
    %144 = arith.mulf %142, %143 : vector<5x256xf32>
    %145 = arith.mulf %135, %113 : vector<5x256xf32>
    %cst_25 = arith.constant 1.000000e+00 : f32
    %146 = vector.broadcast %cst_25 : f32 to vector<5x256xf32>
    %147 = arith.subf %146, %144 : vector<5x256xf32>
    %148 = arith.mulf %147, %114 : vector<5x256xf32>
    %149 = arith.addf %145, %148 : vector<5x256xf32>
    %cst_26 = arith.constant -1.000000e+00 : f32
    %150 = vector.broadcast %cst_26 : f32 to vector<5x256xf32>
    %151 = arith.subf %43, %150 : vector<5x256xf32>
    %cst_27 = arith.constant 5.000000e+00 : f32
    %152 = vector.broadcast %cst_27 : f32 to vector<5x256xf32>
    %153 = arith.mulf %151, %152 : vector<5x256xf32>
    %154 = arith.mulf %144, %114 : vector<5x256xf32>
    %cst_28 = arith.constant 1.000000e+00 : f32
    %155 = vector.broadcast %cst_28 : f32 to vector<5x256xf32>
    %156 = arith.subf %155, %153 : vector<5x256xf32>
    %157 = arith.mulf %156, %115 : vector<5x256xf32>
    %158 = arith.addf %154, %157 : vector<5x256xf32>
    %cst_29 = arith.constant -8.000000e-01 : f32
    %159 = vector.broadcast %cst_29 : f32 to vector<5x256xf32>
    %160 = arith.subf %43, %159 : vector<5x256xf32>
    %cst_30 = arith.constant 5.000000e+00 : f32
    %161 = vector.broadcast %cst_30 : f32 to vector<5x256xf32>
    %162 = arith.mulf %160, %161 : vector<5x256xf32>
    %163 = arith.mulf %153, %115 : vector<5x256xf32>
    %cst_31 = arith.constant 1.000000e+00 : f32
    %164 = vector.broadcast %cst_31 : f32 to vector<5x256xf32>
    %165 = arith.subf %164, %162 : vector<5x256xf32>
    %166 = arith.mulf %165, %116 : vector<5x256xf32>
    %167 = arith.addf %163, %166 : vector<5x256xf32>
    %cst_32 = arith.constant -6.000000e-01 : f32
    %168 = vector.broadcast %cst_32 : f32 to vector<5x256xf32>
    %169 = arith.subf %43, %168 : vector<5x256xf32>
    %cst_33 = arith.constant 5.000000e+00 : f32
    %170 = vector.broadcast %cst_33 : f32 to vector<5x256xf32>
    %171 = arith.mulf %169, %170 : vector<5x256xf32>
    %172 = arith.mulf %162, %116 : vector<5x256xf32>
    %cst_34 = arith.constant 1.000000e+00 : f32
    %173 = vector.broadcast %cst_34 : f32 to vector<5x256xf32>
    %174 = arith.subf %173, %171 : vector<5x256xf32>
    %175 = arith.mulf %174, %117 : vector<5x256xf32>
    %176 = arith.addf %172, %175 : vector<5x256xf32>
    %cst_35 = arith.constant -4.000000e-01 : f32
    %177 = vector.broadcast %cst_35 : f32 to vector<5x256xf32>
    %178 = arith.subf %43, %177 : vector<5x256xf32>
    %cst_36 = arith.constant 5.000000e+00 : f32
    %179 = vector.broadcast %cst_36 : f32 to vector<5x256xf32>
    %180 = arith.mulf %178, %179 : vector<5x256xf32>
    %181 = arith.mulf %171, %117 : vector<5x256xf32>
    %cst_37 = arith.constant 1.000000e+00 : f32
    %182 = vector.broadcast %cst_37 : f32 to vector<5x256xf32>
    %183 = arith.subf %182, %180 : vector<5x256xf32>
    %184 = arith.mulf %183, %118 : vector<5x256xf32>
    %185 = arith.addf %181, %184 : vector<5x256xf32>
    %cst_38 = arith.constant -2.000000e-01 : f32
    %186 = vector.broadcast %cst_38 : f32 to vector<5x256xf32>
    %187 = arith.subf %43, %186 : vector<5x256xf32>
    %cst_39 = arith.constant 5.000000e+00 : f32
    %188 = vector.broadcast %cst_39 : f32 to vector<5x256xf32>
    %189 = arith.mulf %187, %188 : vector<5x256xf32>
    %190 = arith.mulf %180, %118 : vector<5x256xf32>
    %cst_40 = arith.constant 1.000000e+00 : f32
    %191 = vector.broadcast %cst_40 : f32 to vector<5x256xf32>
    %192 = arith.subf %191, %189 : vector<5x256xf32>
    %193 = arith.mulf %192, %119 : vector<5x256xf32>
    %194 = arith.addf %190, %193 : vector<5x256xf32>
    %cst_41 = arith.constant 0.000000e+00 : f32
    %195 = vector.broadcast %cst_41 : f32 to vector<5x256xf32>
    %196 = arith.subf %43, %195 : vector<5x256xf32>
    %cst_42 = arith.constant 5.000000e+00 : f32
    %197 = vector.broadcast %cst_42 : f32 to vector<5x256xf32>
    %198 = arith.mulf %196, %197 : vector<5x256xf32>
    %199 = arith.mulf %189, %119 : vector<5x256xf32>
    %cst_43 = arith.constant 1.000000e+00 : f32
    %200 = vector.broadcast %cst_43 : f32 to vector<5x256xf32>
    %201 = arith.subf %200, %198 : vector<5x256xf32>
    %202 = arith.mulf %201, %120 : vector<5x256xf32>
    %203 = arith.addf %199, %202 : vector<5x256xf32>
    %cst_44 = arith.constant 2.000000e-01 : f32
    %204 = vector.broadcast %cst_44 : f32 to vector<5x256xf32>
    %205 = arith.subf %43, %204 : vector<5x256xf32>
    %cst_45 = arith.constant 5.000000e+00 : f32
    %206 = vector.broadcast %cst_45 : f32 to vector<5x256xf32>
    %207 = arith.mulf %205, %206 : vector<5x256xf32>
    %208 = arith.mulf %198, %120 : vector<5x256xf32>
    %cst_46 = arith.constant 1.000000e+00 : f32
    %209 = vector.broadcast %cst_46 : f32 to vector<5x256xf32>
    %210 = arith.subf %209, %207 : vector<5x256xf32>
    %211 = arith.mulf %210, %121 : vector<5x256xf32>
    %212 = arith.addf %208, %211 : vector<5x256xf32>
    %cst_47 = arith.constant 4.000000e-01 : f32
    %213 = vector.broadcast %cst_47 : f32 to vector<5x256xf32>
    %214 = arith.subf %43, %213 : vector<5x256xf32>
    %cst_48 = arith.constant 5.000000e+00 : f32
    %215 = vector.broadcast %cst_48 : f32 to vector<5x256xf32>
    %216 = arith.mulf %214, %215 : vector<5x256xf32>
    %217 = arith.mulf %207, %121 : vector<5x256xf32>
    %cst_49 = arith.constant 1.000000e+00 : f32
    %218 = vector.broadcast %cst_49 : f32 to vector<5x256xf32>
    %219 = arith.subf %218, %216 : vector<5x256xf32>
    %220 = arith.mulf %219, %122 : vector<5x256xf32>
    %221 = arith.addf %217, %220 : vector<5x256xf32>
    %cst_50 = arith.constant 6.000000e-01 : f32
    %222 = vector.broadcast %cst_50 : f32 to vector<5x256xf32>
    %223 = arith.subf %43, %222 : vector<5x256xf32>
    %cst_51 = arith.constant 5.000000e+00 : f32
    %224 = vector.broadcast %cst_51 : f32 to vector<5x256xf32>
    %225 = arith.mulf %223, %224 : vector<5x256xf32>
    %226 = arith.mulf %216, %122 : vector<5x256xf32>
    %cst_52 = arith.constant 1.000000e+00 : f32
    %227 = vector.broadcast %cst_52 : f32 to vector<5x256xf32>
    %228 = arith.subf %227, %225 : vector<5x256xf32>
    %229 = arith.mulf %228, %123 : vector<5x256xf32>
    %230 = arith.addf %226, %229 : vector<5x256xf32>
    %cst_53 = arith.constant 8.000000e-01 : f32
    %231 = vector.broadcast %cst_53 : f32 to vector<5x256xf32>
    %232 = arith.subf %43, %231 : vector<5x256xf32>
    %cst_54 = arith.constant 5.000000e+00 : f32
    %233 = vector.broadcast %cst_54 : f32 to vector<5x256xf32>
    %234 = arith.mulf %232, %233 : vector<5x256xf32>
    %235 = arith.mulf %225, %123 : vector<5x256xf32>
    %cst_55 = arith.constant 1.000000e+00 : f32
    %236 = vector.broadcast %cst_55 : f32 to vector<5x256xf32>
    %237 = arith.subf %236, %234 : vector<5x256xf32>
    %238 = arith.mulf %237, %124 : vector<5x256xf32>
    %239 = arith.addf %235, %238 : vector<5x256xf32>
    %cst_56 = arith.constant 1.000000e+00 : f32
    %240 = vector.broadcast %cst_56 : f32 to vector<5x256xf32>
    %241 = arith.subf %43, %240 : vector<5x256xf32>
    %cst_57 = arith.constant 5.000000e+00 : f32
    %242 = vector.broadcast %cst_57 : f32 to vector<5x256xf32>
    %243 = arith.mulf %241, %242 : vector<5x256xf32>
    %244 = arith.mulf %234, %124 : vector<5x256xf32>
    %cst_58 = arith.constant 1.000000e+00 : f32
    %245 = vector.broadcast %cst_58 : f32 to vector<5x256xf32>
    %246 = arith.subf %245, %243 : vector<5x256xf32>
    %247 = arith.mulf %246, %125 : vector<5x256xf32>
    %248 = arith.addf %244, %247 : vector<5x256xf32>
    %cst_59 = arith.constant 1.200000e+00 : f32
    %249 = vector.broadcast %cst_59 : f32 to vector<5x256xf32>
    %250 = arith.subf %43, %249 : vector<5x256xf32>
    %cst_60 = arith.constant 5.000000e+00 : f32
    %251 = vector.broadcast %cst_60 : f32 to vector<5x256xf32>
    %252 = arith.mulf %250, %251 : vector<5x256xf32>
    %253 = arith.mulf %243, %125 : vector<5x256xf32>
    %cst_61 = arith.constant 1.000000e+00 : f32
    %254 = vector.broadcast %cst_61 : f32 to vector<5x256xf32>
    %255 = arith.subf %254, %252 : vector<5x256xf32>
    %256 = arith.mulf %255, %126 : vector<5x256xf32>
    %257 = arith.addf %253, %256 : vector<5x256xf32>
    %cst_62 = arith.constant 1.400000e+00 : f32
    %258 = vector.broadcast %cst_62 : f32 to vector<5x256xf32>
    %259 = arith.subf %43, %258 : vector<5x256xf32>
    %cst_63 = arith.constant 5.000000e+00 : f32
    %260 = vector.broadcast %cst_63 : f32 to vector<5x256xf32>
    %261 = arith.mulf %259, %260 : vector<5x256xf32>
    %262 = arith.mulf %252, %126 : vector<5x256xf32>
    %cst_64 = arith.constant 1.000000e+00 : f32
    %263 = vector.broadcast %cst_64 : f32 to vector<5x256xf32>
    %264 = arith.subf %263, %261 : vector<5x256xf32>
    %265 = arith.mulf %264, %127 : vector<5x256xf32>
    %266 = arith.addf %262, %265 : vector<5x256xf32>
    %cst_65 = arith.constant -1.600000e+00 : f32
    %267 = vector.broadcast %cst_65 : f32 to vector<5x256xf32>
    %268 = arith.subf %43, %267 : vector<5x256xf32>
    %cst_66 = arith.constant 2.500000e+00 : f32
    %269 = vector.broadcast %cst_66 : f32 to vector<5x256xf32>
    %270 = arith.mulf %268, %269 : vector<5x256xf32>
    %cst_67 = arith.constant -1.400000e+00 : f32
    %271 = vector.broadcast %cst_67 : f32 to vector<5x256xf32>
    %272 = arith.subf %43, %271 : vector<5x256xf32>
    %cst_68 = arith.constant 2.500000e+00 : f32
    %273 = vector.broadcast %cst_68 : f32 to vector<5x256xf32>
    %274 = arith.mulf %272, %273 : vector<5x256xf32>
    %275 = arith.mulf %270, %140 : vector<5x256xf32>
    %cst_69 = arith.constant 1.000000e+00 : f32
    %276 = vector.broadcast %cst_69 : f32 to vector<5x256xf32>
    %277 = arith.subf %276, %274 : vector<5x256xf32>
    %278 = arith.mulf %277, %149 : vector<5x256xf32>
    %279 = arith.addf %275, %278 : vector<5x256xf32>
    %cst_70 = arith.constant -1.200000e+00 : f32
    %280 = vector.broadcast %cst_70 : f32 to vector<5x256xf32>
    %281 = arith.subf %43, %280 : vector<5x256xf32>
    %cst_71 = arith.constant 2.500000e+00 : f32
    %282 = vector.broadcast %cst_71 : f32 to vector<5x256xf32>
    %283 = arith.mulf %281, %282 : vector<5x256xf32>
    %284 = arith.mulf %274, %149 : vector<5x256xf32>
    %cst_72 = arith.constant 1.000000e+00 : f32
    %285 = vector.broadcast %cst_72 : f32 to vector<5x256xf32>
    %286 = arith.subf %285, %283 : vector<5x256xf32>
    %287 = arith.mulf %286, %158 : vector<5x256xf32>
    %288 = arith.addf %284, %287 : vector<5x256xf32>
    %cst_73 = arith.constant -1.000000e+00 : f32
    %289 = vector.broadcast %cst_73 : f32 to vector<5x256xf32>
    %290 = arith.subf %43, %289 : vector<5x256xf32>
    %cst_74 = arith.constant 2.500000e+00 : f32
    %291 = vector.broadcast %cst_74 : f32 to vector<5x256xf32>
    %292 = arith.mulf %290, %291 : vector<5x256xf32>
    %293 = arith.mulf %283, %158 : vector<5x256xf32>
    %cst_75 = arith.constant 1.000000e+00 : f32
    %294 = vector.broadcast %cst_75 : f32 to vector<5x256xf32>
    %295 = arith.subf %294, %292 : vector<5x256xf32>
    %296 = arith.mulf %295, %167 : vector<5x256xf32>
    %297 = arith.addf %293, %296 : vector<5x256xf32>
    %cst_76 = arith.constant -8.000000e-01 : f32
    %298 = vector.broadcast %cst_76 : f32 to vector<5x256xf32>
    %299 = arith.subf %43, %298 : vector<5x256xf32>
    %cst_77 = arith.constant 2.500000e+00 : f32
    %300 = vector.broadcast %cst_77 : f32 to vector<5x256xf32>
    %301 = arith.mulf %299, %300 : vector<5x256xf32>
    %302 = arith.mulf %292, %167 : vector<5x256xf32>
    %cst_78 = arith.constant 1.000000e+00 : f32
    %303 = vector.broadcast %cst_78 : f32 to vector<5x256xf32>
    %304 = arith.subf %303, %301 : vector<5x256xf32>
    %305 = arith.mulf %304, %176 : vector<5x256xf32>
    %306 = arith.addf %302, %305 : vector<5x256xf32>
    %cst_79 = arith.constant -6.000000e-01 : f32
    %307 = vector.broadcast %cst_79 : f32 to vector<5x256xf32>
    %308 = arith.subf %43, %307 : vector<5x256xf32>
    %cst_80 = arith.constant 2.500000e+00 : f32
    %309 = vector.broadcast %cst_80 : f32 to vector<5x256xf32>
    %310 = arith.mulf %308, %309 : vector<5x256xf32>
    %311 = arith.mulf %301, %176 : vector<5x256xf32>
    %cst_81 = arith.constant 1.000000e+00 : f32
    %312 = vector.broadcast %cst_81 : f32 to vector<5x256xf32>
    %313 = arith.subf %312, %310 : vector<5x256xf32>
    %314 = arith.mulf %313, %185 : vector<5x256xf32>
    %315 = arith.addf %311, %314 : vector<5x256xf32>
    %cst_82 = arith.constant -4.000000e-01 : f32
    %316 = vector.broadcast %cst_82 : f32 to vector<5x256xf32>
    %317 = arith.subf %43, %316 : vector<5x256xf32>
    %cst_83 = arith.constant 2.500000e+00 : f32
    %318 = vector.broadcast %cst_83 : f32 to vector<5x256xf32>
    %319 = arith.mulf %317, %318 : vector<5x256xf32>
    %320 = arith.mulf %310, %185 : vector<5x256xf32>
    %cst_84 = arith.constant 1.000000e+00 : f32
    %321 = vector.broadcast %cst_84 : f32 to vector<5x256xf32>
    %322 = arith.subf %321, %319 : vector<5x256xf32>
    %323 = arith.mulf %322, %194 : vector<5x256xf32>
    %324 = arith.addf %320, %323 : vector<5x256xf32>
    %cst_85 = arith.constant -2.000000e-01 : f32
    %325 = vector.broadcast %cst_85 : f32 to vector<5x256xf32>
    %326 = arith.subf %43, %325 : vector<5x256xf32>
    %cst_86 = arith.constant 2.500000e+00 : f32
    %327 = vector.broadcast %cst_86 : f32 to vector<5x256xf32>
    %328 = arith.mulf %326, %327 : vector<5x256xf32>
    %329 = arith.mulf %319, %194 : vector<5x256xf32>
    %cst_87 = arith.constant 1.000000e+00 : f32
    %330 = vector.broadcast %cst_87 : f32 to vector<5x256xf32>
    %331 = arith.subf %330, %328 : vector<5x256xf32>
    %332 = arith.mulf %331, %203 : vector<5x256xf32>
    %333 = arith.addf %329, %332 : vector<5x256xf32>
    %cst_88 = arith.constant 0.000000e+00 : f32
    %334 = vector.broadcast %cst_88 : f32 to vector<5x256xf32>
    %335 = arith.subf %43, %334 : vector<5x256xf32>
    %cst_89 = arith.constant 2.500000e+00 : f32
    %336 = vector.broadcast %cst_89 : f32 to vector<5x256xf32>
    %337 = arith.mulf %335, %336 : vector<5x256xf32>
    %338 = arith.mulf %328, %203 : vector<5x256xf32>
    %cst_90 = arith.constant 1.000000e+00 : f32
    %339 = vector.broadcast %cst_90 : f32 to vector<5x256xf32>
    %340 = arith.subf %339, %337 : vector<5x256xf32>
    %341 = arith.mulf %340, %212 : vector<5x256xf32>
    %342 = arith.addf %338, %341 : vector<5x256xf32>
    %cst_91 = arith.constant 2.000000e-01 : f32
    %343 = vector.broadcast %cst_91 : f32 to vector<5x256xf32>
    %344 = arith.subf %43, %343 : vector<5x256xf32>
    %cst_92 = arith.constant 2.500000e+00 : f32
    %345 = vector.broadcast %cst_92 : f32 to vector<5x256xf32>
    %346 = arith.mulf %344, %345 : vector<5x256xf32>
    %347 = arith.mulf %337, %212 : vector<5x256xf32>
    %cst_93 = arith.constant 1.000000e+00 : f32
    %348 = vector.broadcast %cst_93 : f32 to vector<5x256xf32>
    %349 = arith.subf %348, %346 : vector<5x256xf32>
    %350 = arith.mulf %349, %221 : vector<5x256xf32>
    %351 = arith.addf %347, %350 : vector<5x256xf32>
    %cst_94 = arith.constant 4.000000e-01 : f32
    %352 = vector.broadcast %cst_94 : f32 to vector<5x256xf32>
    %353 = arith.subf %43, %352 : vector<5x256xf32>
    %cst_95 = arith.constant 2.500000e+00 : f32
    %354 = vector.broadcast %cst_95 : f32 to vector<5x256xf32>
    %355 = arith.mulf %353, %354 : vector<5x256xf32>
    %356 = arith.mulf %346, %221 : vector<5x256xf32>
    %cst_96 = arith.constant 1.000000e+00 : f32
    %357 = vector.broadcast %cst_96 : f32 to vector<5x256xf32>
    %358 = arith.subf %357, %355 : vector<5x256xf32>
    %359 = arith.mulf %358, %230 : vector<5x256xf32>
    %360 = arith.addf %356, %359 : vector<5x256xf32>
    %cst_97 = arith.constant 6.000000e-01 : f32
    %361 = vector.broadcast %cst_97 : f32 to vector<5x256xf32>
    %362 = arith.subf %43, %361 : vector<5x256xf32>
    %cst_98 = arith.constant 2.500000e+00 : f32
    %363 = vector.broadcast %cst_98 : f32 to vector<5x256xf32>
    %364 = arith.mulf %362, %363 : vector<5x256xf32>
    %365 = arith.mulf %355, %230 : vector<5x256xf32>
    %cst_99 = arith.constant 1.000000e+00 : f32
    %366 = vector.broadcast %cst_99 : f32 to vector<5x256xf32>
    %367 = arith.subf %366, %364 : vector<5x256xf32>
    %368 = arith.mulf %367, %239 : vector<5x256xf32>
    %369 = arith.addf %365, %368 : vector<5x256xf32>
    %cst_100 = arith.constant 8.000000e-01 : f32
    %370 = vector.broadcast %cst_100 : f32 to vector<5x256xf32>
    %371 = arith.subf %43, %370 : vector<5x256xf32>
    %cst_101 = arith.constant 2.500000e+00 : f32
    %372 = vector.broadcast %cst_101 : f32 to vector<5x256xf32>
    %373 = arith.mulf %371, %372 : vector<5x256xf32>
    %374 = arith.mulf %364, %239 : vector<5x256xf32>
    %cst_102 = arith.constant 1.000000e+00 : f32
    %375 = vector.broadcast %cst_102 : f32 to vector<5x256xf32>
    %376 = arith.subf %375, %373 : vector<5x256xf32>
    %377 = arith.mulf %376, %248 : vector<5x256xf32>
    %378 = arith.addf %374, %377 : vector<5x256xf32>
    %cst_103 = arith.constant 1.000000e+00 : f32
    %379 = vector.broadcast %cst_103 : f32 to vector<5x256xf32>
    %380 = arith.subf %43, %379 : vector<5x256xf32>
    %cst_104 = arith.constant 2.500000e+00 : f32
    %381 = vector.broadcast %cst_104 : f32 to vector<5x256xf32>
    %382 = arith.mulf %380, %381 : vector<5x256xf32>
    %383 = arith.mulf %373, %248 : vector<5x256xf32>
    %cst_105 = arith.constant 1.000000e+00 : f32
    %384 = vector.broadcast %cst_105 : f32 to vector<5x256xf32>
    %385 = arith.subf %384, %382 : vector<5x256xf32>
    %386 = arith.mulf %385, %257 : vector<5x256xf32>
    %387 = arith.addf %383, %386 : vector<5x256xf32>
    %cst_106 = arith.constant 1.200000e+00 : f32
    %388 = vector.broadcast %cst_106 : f32 to vector<5x256xf32>
    %389 = arith.subf %43, %388 : vector<5x256xf32>
    %cst_107 = arith.constant 2.500000e+00 : f32
    %390 = vector.broadcast %cst_107 : f32 to vector<5x256xf32>
    %391 = arith.mulf %389, %390 : vector<5x256xf32>
    %392 = arith.mulf %382, %257 : vector<5x256xf32>
    %cst_108 = arith.constant 1.000000e+00 : f32
    %393 = vector.broadcast %cst_108 : f32 to vector<5x256xf32>
    %394 = arith.subf %393, %391 : vector<5x256xf32>
    %395 = arith.mulf %394, %266 : vector<5x256xf32>
    %396 = arith.addf %392, %395 : vector<5x256xf32>
    %cst_109 = arith.constant -1.600000e+00 : f32
    %397 = vector.broadcast %cst_109 : f32 to vector<5x256xf32>
    %398 = arith.subf %43, %397 : vector<5x256xf32>
    %cst_110 = arith.constant 1.66666663 : f32
    %399 = vector.broadcast %cst_110 : f32 to vector<5x256xf32>
    %400 = arith.mulf %398, %399 : vector<5x256xf32>
    %cst_111 = arith.constant -1.400000e+00 : f32
    %401 = vector.broadcast %cst_111 : f32 to vector<5x256xf32>
    %402 = arith.subf %43, %401 : vector<5x256xf32>
    %cst_112 = arith.constant 1.66666663 : f32
    %403 = vector.broadcast %cst_112 : f32 to vector<5x256xf32>
    %404 = arith.mulf %402, %403 : vector<5x256xf32>
    %405 = arith.mulf %400, %279 : vector<5x256xf32>
    %cst_113 = arith.constant 1.000000e+00 : f32
    %406 = vector.broadcast %cst_113 : f32 to vector<5x256xf32>
    %407 = arith.subf %406, %404 : vector<5x256xf32>
    %408 = arith.mulf %407, %288 : vector<5x256xf32>
    %409 = arith.addf %405, %408 : vector<5x256xf32>
    %cst_114 = arith.constant -1.200000e+00 : f32
    %410 = vector.broadcast %cst_114 : f32 to vector<5x256xf32>
    %411 = arith.subf %43, %410 : vector<5x256xf32>
    %cst_115 = arith.constant 1.66666663 : f32
    %412 = vector.broadcast %cst_115 : f32 to vector<5x256xf32>
    %413 = arith.mulf %411, %412 : vector<5x256xf32>
    %414 = arith.mulf %404, %288 : vector<5x256xf32>
    %cst_116 = arith.constant 1.000000e+00 : f32
    %415 = vector.broadcast %cst_116 : f32 to vector<5x256xf32>
    %416 = arith.subf %415, %413 : vector<5x256xf32>
    %417 = arith.mulf %416, %297 : vector<5x256xf32>
    %418 = arith.addf %414, %417 : vector<5x256xf32>
    %cst_117 = arith.constant -1.000000e+00 : f32
    %419 = vector.broadcast %cst_117 : f32 to vector<5x256xf32>
    %420 = arith.subf %43, %419 : vector<5x256xf32>
    %cst_118 = arith.constant 1.66666663 : f32
    %421 = vector.broadcast %cst_118 : f32 to vector<5x256xf32>
    %422 = arith.mulf %420, %421 : vector<5x256xf32>
    %423 = arith.mulf %413, %297 : vector<5x256xf32>
    %cst_119 = arith.constant 1.000000e+00 : f32
    %424 = vector.broadcast %cst_119 : f32 to vector<5x256xf32>
    %425 = arith.subf %424, %422 : vector<5x256xf32>
    %426 = arith.mulf %425, %306 : vector<5x256xf32>
    %427 = arith.addf %423, %426 : vector<5x256xf32>
    %cst_120 = arith.constant -8.000000e-01 : f32
    %428 = vector.broadcast %cst_120 : f32 to vector<5x256xf32>
    %429 = arith.subf %43, %428 : vector<5x256xf32>
    %cst_121 = arith.constant 1.66666663 : f32
    %430 = vector.broadcast %cst_121 : f32 to vector<5x256xf32>
    %431 = arith.mulf %429, %430 : vector<5x256xf32>
    %432 = arith.mulf %422, %306 : vector<5x256xf32>
    %cst_122 = arith.constant 1.000000e+00 : f32
    %433 = vector.broadcast %cst_122 : f32 to vector<5x256xf32>
    %434 = arith.subf %433, %431 : vector<5x256xf32>
    %435 = arith.mulf %434, %315 : vector<5x256xf32>
    %436 = arith.addf %432, %435 : vector<5x256xf32>
    %cst_123 = arith.constant -6.000000e-01 : f32
    %437 = vector.broadcast %cst_123 : f32 to vector<5x256xf32>
    %438 = arith.subf %43, %437 : vector<5x256xf32>
    %cst_124 = arith.constant 1.66666663 : f32
    %439 = vector.broadcast %cst_124 : f32 to vector<5x256xf32>
    %440 = arith.mulf %438, %439 : vector<5x256xf32>
    %441 = arith.mulf %431, %315 : vector<5x256xf32>
    %cst_125 = arith.constant 1.000000e+00 : f32
    %442 = vector.broadcast %cst_125 : f32 to vector<5x256xf32>
    %443 = arith.subf %442, %440 : vector<5x256xf32>
    %444 = arith.mulf %443, %324 : vector<5x256xf32>
    %445 = arith.addf %441, %444 : vector<5x256xf32>
    %cst_126 = arith.constant -4.000000e-01 : f32
    %446 = vector.broadcast %cst_126 : f32 to vector<5x256xf32>
    %447 = arith.subf %43, %446 : vector<5x256xf32>
    %cst_127 = arith.constant 1.66666663 : f32
    %448 = vector.broadcast %cst_127 : f32 to vector<5x256xf32>
    %449 = arith.mulf %447, %448 : vector<5x256xf32>
    %450 = arith.mulf %440, %324 : vector<5x256xf32>
    %cst_128 = arith.constant 1.000000e+00 : f32
    %451 = vector.broadcast %cst_128 : f32 to vector<5x256xf32>
    %452 = arith.subf %451, %449 : vector<5x256xf32>
    %453 = arith.mulf %452, %333 : vector<5x256xf32>
    %454 = arith.addf %450, %453 : vector<5x256xf32>
    %cst_129 = arith.constant -2.000000e-01 : f32
    %455 = vector.broadcast %cst_129 : f32 to vector<5x256xf32>
    %456 = arith.subf %43, %455 : vector<5x256xf32>
    %cst_130 = arith.constant 1.66666663 : f32
    %457 = vector.broadcast %cst_130 : f32 to vector<5x256xf32>
    %458 = arith.mulf %456, %457 : vector<5x256xf32>
    %459 = arith.mulf %449, %333 : vector<5x256xf32>
    %cst_131 = arith.constant 1.000000e+00 : f32
    %460 = vector.broadcast %cst_131 : f32 to vector<5x256xf32>
    %461 = arith.subf %460, %458 : vector<5x256xf32>
    %462 = arith.mulf %461, %342 : vector<5x256xf32>
    %463 = arith.addf %459, %462 : vector<5x256xf32>
    %cst_132 = arith.constant 0.000000e+00 : f32
    %464 = vector.broadcast %cst_132 : f32 to vector<5x256xf32>
    %465 = arith.subf %43, %464 : vector<5x256xf32>
    %cst_133 = arith.constant 1.66666663 : f32
    %466 = vector.broadcast %cst_133 : f32 to vector<5x256xf32>
    %467 = arith.mulf %465, %466 : vector<5x256xf32>
    %468 = arith.mulf %458, %342 : vector<5x256xf32>
    %cst_134 = arith.constant 1.000000e+00 : f32
    %469 = vector.broadcast %cst_134 : f32 to vector<5x256xf32>
    %470 = arith.subf %469, %467 : vector<5x256xf32>
    %471 = arith.mulf %470, %351 : vector<5x256xf32>
    %472 = arith.addf %468, %471 : vector<5x256xf32>
    %cst_135 = arith.constant 2.000000e-01 : f32
    %473 = vector.broadcast %cst_135 : f32 to vector<5x256xf32>
    %474 = arith.subf %43, %473 : vector<5x256xf32>
    %cst_136 = arith.constant 1.66666663 : f32
    %475 = vector.broadcast %cst_136 : f32 to vector<5x256xf32>
    %476 = arith.mulf %474, %475 : vector<5x256xf32>
    %477 = arith.mulf %467, %351 : vector<5x256xf32>
    %cst_137 = arith.constant 1.000000e+00 : f32
    %478 = vector.broadcast %cst_137 : f32 to vector<5x256xf32>
    %479 = arith.subf %478, %476 : vector<5x256xf32>
    %480 = arith.mulf %479, %360 : vector<5x256xf32>
    %481 = arith.addf %477, %480 : vector<5x256xf32>
    %cst_138 = arith.constant 4.000000e-01 : f32
    %482 = vector.broadcast %cst_138 : f32 to vector<5x256xf32>
    %483 = arith.subf %43, %482 : vector<5x256xf32>
    %cst_139 = arith.constant 1.66666663 : f32
    %484 = vector.broadcast %cst_139 : f32 to vector<5x256xf32>
    %485 = arith.mulf %483, %484 : vector<5x256xf32>
    %486 = arith.mulf %476, %360 : vector<5x256xf32>
    %cst_140 = arith.constant 1.000000e+00 : f32
    %487 = vector.broadcast %cst_140 : f32 to vector<5x256xf32>
    %488 = arith.subf %487, %485 : vector<5x256xf32>
    %489 = arith.mulf %488, %369 : vector<5x256xf32>
    %490 = arith.addf %486, %489 : vector<5x256xf32>
    %cst_141 = arith.constant 6.000000e-01 : f32
    %491 = vector.broadcast %cst_141 : f32 to vector<5x256xf32>
    %492 = arith.subf %43, %491 : vector<5x256xf32>
    %cst_142 = arith.constant 1.66666663 : f32
    %493 = vector.broadcast %cst_142 : f32 to vector<5x256xf32>
    %494 = arith.mulf %492, %493 : vector<5x256xf32>
    %495 = arith.mulf %485, %369 : vector<5x256xf32>
    %cst_143 = arith.constant 1.000000e+00 : f32
    %496 = vector.broadcast %cst_143 : f32 to vector<5x256xf32>
    %497 = arith.subf %496, %494 : vector<5x256xf32>
    %498 = arith.mulf %497, %378 : vector<5x256xf32>
    %499 = arith.addf %495, %498 : vector<5x256xf32>
    %cst_144 = arith.constant 8.000000e-01 : f32
    %500 = vector.broadcast %cst_144 : f32 to vector<5x256xf32>
    %501 = arith.subf %43, %500 : vector<5x256xf32>
    %cst_145 = arith.constant 1.66666663 : f32
    %502 = vector.broadcast %cst_145 : f32 to vector<5x256xf32>
    %503 = arith.mulf %501, %502 : vector<5x256xf32>
    %504 = arith.mulf %494, %378 : vector<5x256xf32>
    %cst_146 = arith.constant 1.000000e+00 : f32
    %505 = vector.broadcast %cst_146 : f32 to vector<5x256xf32>
    %506 = arith.subf %505, %503 : vector<5x256xf32>
    %507 = arith.mulf %506, %387 : vector<5x256xf32>
    %508 = arith.addf %504, %507 : vector<5x256xf32>
    %cst_147 = arith.constant 1.000000e+00 : f32
    %509 = vector.broadcast %cst_147 : f32 to vector<5x256xf32>
    %510 = arith.subf %43, %509 : vector<5x256xf32>
    %cst_148 = arith.constant 1.66666663 : f32
    %511 = vector.broadcast %cst_148 : f32 to vector<5x256xf32>
    %512 = arith.mulf %510, %511 : vector<5x256xf32>
    %513 = arith.mulf %503, %387 : vector<5x256xf32>
    %cst_149 = arith.constant 1.000000e+00 : f32
    %514 = vector.broadcast %cst_149 : f32 to vector<5x256xf32>
    %515 = arith.subf %514, %512 : vector<5x256xf32>
    %516 = arith.mulf %515, %396 : vector<5x256xf32>
    %517 = arith.addf %513, %516 : vector<5x256xf32>
    %518 = vector.broadcast %3 : vector<5x1xf32> to vector<5x256xf32>
    %519 = arith.mulf %518, %409 : vector<5x256xf32>
    %520 = vector.broadcast %6 : vector<5x1xf32> to vector<5x256xf32>
    %521 = arith.mulf %520, %418 : vector<5x256xf32>
    %522 = arith.addf %519, %521 : vector<5x256xf32>
    %523 = vector.broadcast %9 : vector<5x1xf32> to vector<5x256xf32>
    %524 = arith.mulf %523, %427 : vector<5x256xf32>
    %525 = arith.addf %522, %524 : vector<5x256xf32>
    %526 = vector.broadcast %12 : vector<5x1xf32> to vector<5x256xf32>
    %527 = arith.mulf %526, %436 : vector<5x256xf32>
    %528 = arith.addf %525, %527 : vector<5x256xf32>
    %529 = vector.broadcast %15 : vector<5x1xf32> to vector<5x256xf32>
    %530 = arith.mulf %529, %445 : vector<5x256xf32>
    %531 = arith.addf %528, %530 : vector<5x256xf32>
    %532 = vector.broadcast %18 : vector<5x1xf32> to vector<5x256xf32>
    %533 = arith.mulf %532, %454 : vector<5x256xf32>
    %534 = arith.addf %531, %533 : vector<5x256xf32>
    %535 = vector.broadcast %21 : vector<5x1xf32> to vector<5x256xf32>
    %536 = arith.mulf %535, %463 : vector<5x256xf32>
    %537 = arith.addf %534, %536 : vector<5x256xf32>
    %538 = vector.broadcast %24 : vector<5x1xf32> to vector<5x256xf32>
    %539 = arith.mulf %538, %472 : vector<5x256xf32>
    %540 = arith.addf %537, %539 : vector<5x256xf32>
    %541 = vector.broadcast %27 : vector<5x1xf32> to vector<5x256xf32>
    %542 = arith.mulf %541, %481 : vector<5x256xf32>
    %543 = arith.addf %540, %542 : vector<5x256xf32>
    %544 = vector.broadcast %30 : vector<5x1xf32> to vector<5x256xf32>
    %545 = arith.mulf %544, %490 : vector<5x256xf32>
    %546 = arith.addf %543, %545 : vector<5x256xf32>
    %547 = vector.broadcast %33 : vector<5x1xf32> to vector<5x256xf32>
    %548 = arith.mulf %547, %499 : vector<5x256xf32>
    %549 = arith.addf %546, %548 : vector<5x256xf32>
    %550 = vector.broadcast %36 : vector<5x1xf32> to vector<5x256xf32>
    %551 = arith.mulf %550, %508 : vector<5x256xf32>
    %552 = arith.addf %549, %551 : vector<5x256xf32>
    %553 = vector.broadcast %39 : vector<5x1xf32> to vector<5x256xf32>
    %554 = arith.mulf %553, %517 : vector<5x256xf32>
    %555 = arith.addf %552, %554 : vector<5x256xf32>
    %c0_150 = arith.constant 0 : index
    %556 = arith.index_cast %41 : i32 to index
    %557 = vector.load %arg3[%c0_150, %556] : memref<5x256xf32, #tpu.memory_space<vmem>>, vector<5x256xf32>
    tpu.vector_store %arg3[%c0_150, %556], %555 {strides = array<i32>} : memref<5x256xf32, #tpu.memory_space<vmem>>, vector<5x256xf32>,
    %c1_i32 = arith.constant 1 : i32
    return
  }
  func.func @transform_0(%arg0: i32) -> (i32, i32) {
    %c0_i32 = arith.constant 0 : i32
    %c0_i32_0 = arith.constant 0 : i32
    return %c0_i32, %arg0 : i32, i32
  }
  func.func @transform_1(%arg0: i32) -> (i32, i32) {
    %c0_i32 = arith.constant 0 : i32
    %c0_i32_0 = arith.constant 0 : i32
    %c0_i32_1 = arith.constant 0 : i32
    return %c0_i32, %c0_i32_0 : i32, i32
  }
  func.func @transform_2(%arg0: i32) -> (i32, i32) {
    %c0_i32 = arith.constant 0 : i32
    %c0_i32_0 = arith.constant 0 : i32
    return %c0_i32, %arg0 : i32, i32
  }
}

</mosaic_0001>

<bundles_post_ra>
// kernel: spline_activation_forward_dn.1
= control target key start
LH: loop header
LB: loop body
LE: loop exit
PB: predicated region body
PF: predicated region fallthrough
CT: control target
= control target key end

     0   :  { %7 = vsyncpa [#allocation3], 0  ;;  %s1556_s0 = inlined_call_operand.hbm [shape: f32[5,256], index: 0, kind: input, shape index: {}]   ;;  %s1557_s1 = inlined_call_operand.hbm [shape: f32[5,13], index: 1, kind: input, shape index: {}]   ;;  %s1558_s2 = inlined_call_operand.hbm [shape: f32[5,256], index: 2, kind: output, shape index: {}]  }
   0x1   :  { %8 = vsyncpa [#allocation6], 0 }
   0x2   :  { %9 = vsyncpa [#allocation4], 0  ;;  %s15_s11 = sshll.u32 %s1556_s0, 4  ;;  %s931_s12 = smov [#allocation2]   ;;  %s16_s11 = int_to_ptr.hbm [resolvable:$true] %s15_s11 }
   0x3   :  { %s17_s13 = sshll.u32 %s931_s12, 4  ;;  %s26_s16 = sshll.u32 %s1557_s1, 4  ;;  %s18_s13 = int_to_ptr.vmem [resolvable:$true] %s17_s13  ;;  %s27_s16 = int_to_ptr.hbm [resolvable:$true] %s26_s16 }
   0x4   :  { %20 = dma.hbm_to_vmem [thread:$0]  %s16_s11, 256, %s18_s13, [#allocation3]  }
   0x5   :  { %s932_s17 = smov [#allocation5]  }
   0x6   :  { %s28_s18 = sshll.u32 %s932_s17, 4  ;;  %s29_s18 = int_to_ptr.vmem [resolvable:$true] %s28_s18 }
   0x7   :  { %31 = dma.hbm_to_vmem [thread:$0]  %s27_s16, 128, %s29_s18, [#allocation6]  }
   0x8   :  { %925 = dma.done.wait [#allocation3], 256  }
   0x9   :  { %926 = vsyncadd [#allocation3], 4294967040 }
   0xa   :  { %927 = dma.done.wait [#allocation6], 128  }
   0xb   :  { %928 = vsyncadd [#allocation6], 4294967168  ;;  %v933_v0 = vmov 2   ;;  %v934_v1 = vmov 0   ;;  %v935_v2 = vmov 4   ;;  %v936_v4 = vmov 3  }
   0xc   :  { %839 = vset.pattern.permute.xlu1 %v933_v0  ;;  %837 = vset.pattern.permute.xlu0 %v934_v1  ;;  %v40_v3 = vld [vmem:[#allocation5] sm:$0x1f]  ;;  %v937_v5 = vmov 1   ;;  %v938_v6 = vmov 5   ;;  %v939_v7 = vmov 6   ;;  %v940_v8 = vmov 8  }
   0xd   :  { %841 = vset.pattern.permute.xlu2 %v935_v2  ;;  %649 = vperm.xlu1 %839, %v40_v3   ;;  %v941_v9 = vmov 7   ;;  %v942_v10 = vmov 9   ;;  %v943_v11 = vmov 12   ;;  %v944_v12 = vmov 10   ;;  %v969_v14 = vld [vmem:[#allocation2] sm:$0x1f] }
   0xe   :  { %635 = vperm.xlu0 %837, %v40_v3   ;;  %665 = vperm.xlu2 %841, %v40_v3   ;;  %v945_v13 = vmov 11   ;;  %1569 = vst [vmem:[#allocation11_spill] sm:$0xff] %v969_v14  ;;  %v971_v15 = vld [vmem:[#allocation2 + $0x8] sm:$0x1f]  ;;  %vm55_vm0 = vcmp.ge.f32.partialorder %v969_v14, -1.2 }
   0xf   :  { %1570 = vst [vmem:[#allocation12_spill] sm:$0xff] %v971_v15  ;;  %vm56_vm1 = vcmp.ge.f32.partialorder %v971_v15, -1.2  ;;  %vm61_vm2 = vcmp.ge.f32.partialorder %v969_v14, -1.0  ;;  %vm62_vm3 = vcmp.ge.f32.partialorder %v971_v15, -1.0  ;;  %v1559_v16 = vmov 0.0  }
  0x10   :  { %v978_v17 = vsel %vm55_vm0, 1.0, %v1559_v16  ;;  %v981_v18 = vsel %vm56_vm1, 1.0, %v1559_v16  ;;  %vm67_vm4 = vcmp.ge.f32.partialorder %v969_v14, -0.8  ;;  %v762_v19 = vsel %vm61_vm2, 1.0, %v1559_v16  ;;  %s947_s0 = smov [#allocation7]  }
  0x11   :  { %vm68_vm5 = vcmp.ge.f32.partialorder %v971_v15, -0.8  ;;  %vm73_vm6 = vcmp.ge.f32.partialorder %v969_v14, -0.6  ;;  %v988_v20 = vadd.f32 1.0, %v969_v14  ;;  %v763_v21 = vsel %vm62_vm3, 1.0, %v1559_v16 }
  0x12   :  { %v992_v22 = vadd.f32 1.0, %v971_v15  ;;  %v995_v23 = vadd.f32 0.8, %v969_v14  ;;  %v998_v24 = vadd.f32 0.8, %v971_v15  ;;  %v1007_v26 = vsub.f32 %v978_v17, %v762_v19  ;;  %s743_s1 = sshll.u32 %s947_s0, 4  ;;  %s744_s1 = int_to_ptr.vmem [resolvable:$true] %s743_s1 }
  0x13   :  { %vm74_vm7 = vcmp.ge.f32.partialorder %v971_v15, -0.6  ;;  %vm79_vm8 = vcmp.ge.f32.partialorder %v969_v14, -0.4  ;;  %v1003_v25 = vadd.f32 0.6, %v969_v14  ;;  %v1040_v41 = vsub.f32 %v981_v18, %v763_v21 }
  0x14   :  { %vm80_vm9 = vcmp.ge.f32.partialorder %v971_v15, -0.4  ;;  %v1010_v27 = vadd.f32 1.2, %v969_v14  ;;  %v1013_v28 = vadd.f32 0.6, %v971_v15 }
  0x15   :  { %840 = vset.pattern.permute.xlu1 %v936_v4  ;;  %v764_v29 = vsel %vm67_vm4, 1.0, %v1559_v16  ;;  %v765_v30 = vsel %vm68_vm5, 1.0, %v1559_v16  ;;  %v1020_v31 = vadd.f32 1.2, %v971_v15  ;;  %v207_v32 = vmul.f32 5.0, %v988_v20  ;;  %s745_s21 = sshll.u32 %s1558_s2, 4  ;;  %s746_s21 = int_to_ptr.hbm [resolvable:$true] %s745_s21 }
  0x16   :  { %838 = vset.pattern.permute.xlu0 %v937_v5  ;;  %657 = vperm.xlu1 %840, %v40_v3   ;;  %v766_v33 = vsel %vm73_vm6, 1.0, %v1559_v16  ;;  %v208_v34 = vmul.f32 5.0, %v992_v22  ;;  %v219_v35 = vmul.f32 5.0, %v995_v23  ;;  %v220_v36 = vmul.f32 5.0, %v998_v24 }
  0x17   :  { %641 = vperm.xlu0 %838, %v40_v3   ;;  %842 = vset.pattern.permute.xlu2 %v938_v6  ;;  %v767_v37 = vsel %vm74_vm7, 1.0, %v1559_v16  ;;  %v1031_v38 = vsel %vm79_vm8, 1.0, %v1559_v16  ;;  %v1034_v39 = vsel %vm80_vm9, 1.0, %v1559_v16  ;;  %v1037_v40 = vmul.f32 5.0, %v1003_v25 }
  0x18   :  { %673 = vperm.xlu2 %842, %v40_v3   ;;  %v151_v42 = vsub.f32 %v762_v19, %v764_v29  ;;  %v1043_v43 = vmul.f32 5.0, %v1010_v27  ;;  %v1046_v44 = vmul.f32 5.0, %v1013_v28  ;;  %v152_v45 = vsub.f32 %v763_v21, %v765_v30 }
  0x19   :  { %v153_v46 = vsub.f32 %v764_v29, %v766_v33  ;;  %v1049_v47 = vmul.f32 5.0, %v1020_v31  ;;  %v211_v48 = vsub.f32 1.0, %v207_v32  ;;  %v154_v49 = vsub.f32 %v765_v30, %v767_v37 }
  0x1a   :  { %v212_v50 = vsub.f32 1.0, %v208_v34  ;;  %v223_v51 = vsub.f32 1.0, %v219_v35  ;;  %v224_v52 = vsub.f32 1.0, %v220_v36  ;;  %v1052_v53 = vsub.f32 %v766_v33, %v1031_v38 }
  0x1b   :  { %v235_v54 = vsub.f32 1.0, %v1037_v40  ;;  %v1056_v55 = vsub.f32 %v767_v37, %v1034_v39  ;;  %v209_v56 = vmul.f32 %v1043_v43, %v1007_v26  ;;  %v236_v57 = vsub.f32 1.0, %v1046_v44 }
  0x1c   :  { %v210_v58 = vmul.f32 %v1049_v47, %v1040_v41  ;;  %v213_v59 = vmul.f32 %v211_v48, %v151_v42  ;;  %v221_v60 = vmul.f32 %v207_v32, %v151_v42  ;;  %v222_v61 = vmul.f32 %v208_v34, %v152_v45 }
  0x1d   :  { %v214_v62 = vmul.f32 %v212_v50, %v152_v45  ;;  %v225_v63 = vmul.f32 %v223_v51, %v153_v46  ;;  %v226_v0 = vmul.f32 %v224_v52, %v154_v49  ;;  %v381_v1 = vmul.f32 2.5, %v988_v20 }
  0x1e   :  { %843 = vset.pattern.permute.xlu1 %v939_v7  ;;  %v233_v2 = vmul.f32 %v219_v35, %v153_v46  ;;  %v382_v4 = vmul.f32 2.5, %v992_v22  ;;  %v1067_v5 = vmul.f32 2.5, %v995_v23  ;;  %v234_v6 = vmul.f32 %v220_v36, %v154_v49 }
  0x1f   :  { %845 = vset.pattern.permute.xlu0 %v940_v8  ;;  %681 = vperm.xlu1 %843, %v40_v3   ;;  %v238_v7 = vmul.f32 %v236_v57, %v1056_v55  ;;  %v1071_v8 = vmul.f32 2.5, %v998_v24  ;;  %v385_v19 = vsub.f32 1.0, %v381_v1  ;;  %v1083_v29 = vmul.f32 2.5, %v1020_v31 }
  0x20   :  { %697 = vperm.xlu0 %845, %v40_v3   ;;  %844 = vset.pattern.permute.xlu2 %v941_v9  ;;  %v1073_v9 = vadd.f32 %v213_v59, %v209_v56  ;;  %v386_v30 = vsub.f32 1.0, %v382_v4  ;;  %v395_v32 = vsub.f32 1.0, %v1067_v5  ;;  %v1096_v50 = vmul.f32 1.6666666, %v988_v20 }
  0x21   :  { %689 = vperm.xlu2 %844, %v40_v3   ;;  %v1086_v33 = vadd.f32 %v238_v7, %v234_v6  ;;  %v396_v34 = vsub.f32 1.0, %v1071_v8  ;;  %v1099_v51 = vmul.f32 1.6666666, %v992_v22  ;;  %vm85_vm10 = vcmp.ge.f32.partialorder %v969_v14, -0.2 }
  0x22   :  { %vm86_vm11 = vcmp.ge.f32.partialorder %v971_v15, -0.2  ;;  %vm91_vm12 = vcmp.ge.f32.partialorder %v969_v14, 0.0  ;;  %vm92_vm13 = vcmp.ge.f32.partialorder %v971_v15, 0.0  ;;  %vm43_vm14 = vcmp.ge.f32.partialorder %v969_v14, -1.6 }
  0x23   :  { %v398_v49 = vmul.f32 %v396_v34, %v1086_v33  ;;  %v1153_v6 = vsel %vm92_vm13, 1.0, %v1559_v16  ;;  %vm44_vm15 = vcmp.ge.f32.partialorder %v971_v15, -1.6  ;;  %vm49_vm0 = vcmp.ge.f32.partialorder %v969_v14, -1.4 }
  0x24   :  { %vm50_vm1 = vcmp.ge.f32.partialorder %v971_v15, -1.4 }
  0x27   :  { %846 = vset.pattern.permute.xlu1 %v942_v10  ;;  %v1076_v10 = vmul.f32 2.5, %v1010_v27 }
  0x28   :  { %850 = vset.pattern.permute.xlu0 %v943_v11  ;;  %705 = vperm.xlu1 %846, %v40_v3  }
  0x29   :  { %847 = vset.pattern.permute.xlu2 %v944_v12  ;;  %v227_v12 = vadd.f32 %v225_v63, %v221_v60  ;;  %v383_v35 = vmul.f32 %v1076_v10, %v1073_v9  ;;  %v771_v60 = vsel %vm86_vm11, 1.0, %v1559_v16 }
  0x2a   :  { %713 = vperm.xlu2 %847, %v40_v3  }
  0x2b   :  { %v387_v36 = vmul.f32 %v385_v19, %v227_v12  ;;  %v393_v45 = vmul.f32 %v381_v1, %v227_v12  ;;  %v1141_v1 = vadd.f32 0.2, %v969_v14  ;;  %v1162_v12 = vsub.f32 %v1034_v39, %v771_v60 }
  0x2c   :  { %v757_v19 = vsel %vm44_vm15, 1.0, %v1559_v16  ;;  %v791_v39 = vadd.f32 1.6, %v971_v15 }
  0x2d   :  { %v1101_v52 = vadd.f32 %v387_v36, %v383_v35  ;;  %v790_v35 = vadd.f32 1.6, %v969_v14 }
  0x2f   :  { %1571 = vst [vmem:[#allocation13_spill] sm:$0xff] %v1101_v52 }
  0x30   :  { %848 = vset.pattern.permute.xlu1 %v945_v13  ;;  %v228_v13 = vadd.f32 %v226_v0, %v222_v61  ;;  %v1128_v61 = vadd.f32 0.4, %v969_v14  ;;  %v1138_v0 = vsel %vm91_vm12, 1.0, %v1559_v16 }
  0x31   :  { %721 = vperm.xlu1 %848, %v40_v3  }
  0x32   :  { %849 = vset.pattern.permute.xlu2 %v943_v11  ;;  %v1078_v11 = vadd.f32 %v214_v62, %v210_v58  ;;  %v388_v42 = vmul.f32 %v386_v30, %v228_v13  ;;  %v394_v48 = vmul.f32 %v382_v4, %v228_v13  ;;  %v1111_v58 = vmul.f32 1.6666666, %v1020_v31 }
  0x33   :  { %729 = vperm.xlu2 %849, %v40_v3   ;;  %v237_v3 = vmul.f32 %v235_v54, %v1052_v53  ;;  %v1104_v54 = vmul.f32 1.6666666, %v1010_v27  ;;  %v770_v27 = vsel %vm85_vm10, 1.0, %v1559_v16  ;;  %v1131_v62 = vadd.f32 0.4, %v971_v15 }
  0x34   :  { %v384_v37 = vmul.f32 %v1083_v29, %v1078_v11  ;;  %1574 = vst [vmem:[#allocation16_spill] sm:$0xff] %v1111_v58  ;;  %v1113_v59 = vadd.f32 %v398_v49, %v394_v48  ;;  %v1150_v4 = vadd.f32 1.4, %v971_v15  ;;  %v1156_v7 = vsub.f32 %v1031_v38, %v770_v27 }
  0x35   :  { %v1080_v21 = vadd.f32 %v237_v3, %v233_v2  ;;  %1572 = vst [vmem:[#allocation14_spill] sm:$0xff] %v1104_v54  ;;  %v1124_v31 = vmul.f32 %v1104_v54, %v1101_v52  ;;  %v1144_v2 = vadd.f32 0.2, %v971_v15  ;;  %v1147_v3 = vadd.f32 1.4, %v969_v14 }
  0x36   :  { %v1106_v56 = vadd.f32 %v388_v42, %v384_v37  ;;  %v756_v13 = vsel %vm43_vm14, 1.0, %v1559_v16  ;;  %v758_v30 = vsel %vm49_vm0, 1.0, %v1559_v16  ;;  %v759_v38 = vsel %vm50_vm1, 1.0, %v1559_v16 }
  0x37   :  { %v397_v46 = vmul.f32 %v395_v32, %v1080_v21  ;;  %v145_v32 = vsub.f32 %v756_v13, %v758_v30  ;;  %v147_v34 = vsub.f32 %v758_v30, %v978_v17  ;;  %v146_v36 = vsub.f32 %v757_v19, %v759_v38 }
  0x38   :  { %1573 = vst [vmem:[#allocation15_spill] sm:$0xff] %v1106_v56  ;;  %v1135_v63 = vmul.f32 %v1111_v58, %v1106_v56  ;;  %v148_v37 = vsub.f32 %v759_v38, %v981_v18  ;;  %v183_v42 = vmul.f32 5.0, %v1147_v3  ;;  %v199_v48 = vsub.f32 1.0, %v1043_v43 }
  0x39   :  { %v1108_v57 = vadd.f32 %v397_v46, %v393_v45  ;;  %v179_v45 = vmul.f32 5.0, %v790_v35  ;;  %v184_v46 = vmul.f32 5.0, %v1150_v4  ;;  %v200_v49 = vsub.f32 1.0, %v1049_v47 }
  0x3a   :  { %v180_v16 = vmul.f32 5.0, %v791_v39  ;;  %v187_v13 = vsub.f32 1.0, %v183_v42  ;;  %v197_v22 = vmul.f32 %v183_v42, %v147_v34  ;;  %v361_v17 = vmul.f32 2.5, %v1147_v3 }
  0x3b   :  { %v185_v30 = vmul.f32 %v179_v45, %v145_v32  ;;  %v188_v19 = vsub.f32 1.0, %v184_v46  ;;  %v198_v20 = vmul.f32 %v184_v46, %v148_v37  ;;  %v201_v18 = vmul.f32 %v199_v48, %v1007_v26 }
  0x3c   :  { %v186_v38 = vmul.f32 %v180_v16, %v146_v36  ;;  %v189_v56 = vmul.f32 %v187_v13, %v147_v34  ;;  %v202_v52 = vmul.f32 %v200_v49, %v1040_v41  ;;  %v359_v58 = vmul.f32 2.5, %v790_v35 }
  0x3d   :  { %v190_v54 = vmul.f32 %v188_v19, %v148_v37  ;;  %v203_v15 = vadd.f32 %v201_v18, %v197_v22  ;;  %v362_v43 = vmul.f32 2.5, %v1150_v4  ;;  %v1182_v47 = vsub.f32 %v770_v27, %v1138_v0 }
  0x3e   :  { %v191_v42 = vadd.f32 %v189_v56, %v185_v30  ;;  %v365_v14 = vsub.f32 1.0, %v361_v17  ;;  %v375_v32 = vsub.f32 1.0, %v1076_v10  ;;  %v243_v45 = vmul.f32 5.0, %v1128_v61 }
  0x3f   :  { %v192_v46 = vadd.f32 %v190_v54, %v186_v38  ;;  %v204_v26 = vadd.f32 %v202_v52, %v198_v20  ;;  %v360_v16 = vmul.f32 2.5, %v791_v39  ;;  %v366_v34 = vsub.f32 1.0, %v362_v43 }
  0x40   :  { %v363_v36 = vmul.f32 %v359_v58, %v191_v42  ;;  %v367_v41 = vmul.f32 %v365_v14, %v203_v15  ;;  %v376_v37 = vsub.f32 1.0, %v1083_v29  ;;  %v244_v22 = vmul.f32 5.0, %v1131_v62 }
  0x41   :  { %v1189_v48 = vsub.f32 %v771_v60, %v1153_v6  ;;  %v245_v56 = vmul.f32 %v1037_v40, %v1052_v53  ;;  %v246_v10 = vmul.f32 %v1046_v44, %v1056_v55  ;;  %v1196_v54 = vmul.f32 5.0, %v1141_v1 }
  0x42   :  { %v373_v52 = vmul.f32 %v361_v17, %v203_v15  ;;  %v377_v58 = vmul.f32 %v375_v32, %v1073_v9  ;;  %v1200_v14 = vmul.f32 5.0, %v1144_v2  ;;  %v257_v29 = vmul.f32 %v243_v45, %v1156_v7 }
  0x43   :  { %v364_v20 = vmul.f32 %v360_v16, %v192_v46  ;;  %v368_v27 = vmul.f32 %v366_v34, %v204_v26  ;;  %v374_v60 = vmul.f32 %v362_v43, %v204_v26  ;;  %v247_v49 = vsub.f32 1.0, %v243_v45 }
  0x44   :  { %v369_v13 = vadd.f32 %v367_v41, %v363_v36  ;;  %v378_v40 = vmul.f32 %v376_v37, %v1078_v11  ;;  %v501_v53 = vmul.f32 1.6666666, %v790_v35  ;;  %v248_v44 = vsub.f32 1.0, %v244_v22 }
  0x45   :  { %v1205_v55 = vmul.f32 1.6666666, %v1147_v3  ;;  %v1208_v15 = vmul.f32 1.6666666, %v1150_v4  ;;  %v249_v9 = vmul.f32 %v247_v49, %v1156_v7  ;;  %v259_v17 = vsub.f32 1.0, %v1196_v54 }
  0x46   :  { %v1212_v30 = vadd.f32 %v377_v58, %v373_v52  ;;  %v250_v19 = vmul.f32 %v248_v44, %v1162_v12  ;;  %v260_v18 = vsub.f32 1.0, %v1200_v14  ;;  %v401_v11 = vmul.f32 2.5, %v1003_v25 }
  0x47   :  { %v502_v35 = vmul.f32 1.6666666, %v791_v39  ;;  %v258_v38 = vmul.f32 %v244_v22, %v1162_v12  ;;  %v261_v3 = vmul.f32 %v259_v17, %v1182_v47  ;;  %v402_v4 = vmul.f32 2.5, %v1013_v28 }
  0x48   :  { %v370_v43 = vadd.f32 %v368_v27, %v364_v20  ;;  %v251_v42 = vadd.f32 %v249_v9, %v245_v56  ;;  %v252_v7 = vadd.f32 %v250_v19, %v246_v10  ;;  %v262_v32 = vmul.f32 %v260_v18, %v1189_v48 }
  0x49   :  { %v380_v45 = vadd.f32 %v378_v40, %v374_v60  ;;  %v507_v46 = vsub.f32 1.0, %v1205_v55  ;;  %v508_v26 = vsub.f32 1.0, %v1208_v15  ;;  %v405_v16 = vsub.f32 1.0, %v401_v11 }
  0x4a   :  { %v1223_v34 = vadd.f32 %v261_v3, %v257_v29  ;;  %v406_v39 = vsub.f32 1.0, %v402_v4  ;;  %v1226_v12 = vmul.f32 2.5, %v1128_v61  ;;  %v1229_v36 = vmul.f32 2.5, %v1131_v62 }
  0x4b   :  { %v1575_v41 = vsub.f32 1.0, %v1096_v50  ;;  %v1234_v22 = vadd.f32 %v262_v32, %v258_v38  ;;  %v403_v56 = vmul.f32 %v1067_v5, %v1080_v21  ;;  %v404_v10 = vmul.f32 %v1071_v8, %v1086_v33 }
  0x4c   :  { %v407_v52 = vmul.f32 %v405_v16, %v251_v42  ;;  %v408_v58 = vmul.f32 %v406_v39, %v252_v7  ;;  %v415_v29 = vsub.f32 1.0, %v1226_v12  ;;  %v416_v20 = vsub.f32 1.0, %v1229_v36 }
  0x4d   :  { %v529_v37 = vmul.f32 %v1575_v41, %v1108_v57  ;;  %v1576_v27 = vsub.f32 1.0, %v1099_v51  ;;  %v505_v49 = vmul.f32 %v501_v53, %v369_v13  ;;  %v506_v40 = vmul.f32 %v502_v35, %v370_v43 }
  0x4e   :  { %v509_v44 = vmul.f32 %v507_v46, %v1212_v30  ;;  %v510_v9 = vmul.f32 %v508_v26, %v380_v45  ;;  %v413_v17 = vmul.f32 %v401_v11, %v251_v42  ;;  %v417_v5 = vmul.f32 %v415_v29, %v1223_v34 }
  0x4f   :  { %v530_v60 = vmul.f32 %v1576_v27, %v1113_v59  ;;  %v1248_v8 = vmul.f32 1.6666666, %v1003_v25  ;;  %v414_v21 = vmul.f32 %v402_v4, %v252_v7  ;;  %v418_v33 = vmul.f32 %v416_v20, %v1234_v22 }
  0x50   :  { %v533_v19 = vmul.f32 1.6666666, %v995_v23  ;;  %v1253_v18 = vmul.f32 1.6666666, %v1013_v28  ;;  %v409_v38 = vadd.f32 %v407_v52, %v403_v56  ;;  %v410_v13 = vadd.f32 %v408_v58, %v404_v10  ;;  %v1580_v10 = vld [vmem:[#allocation14_spill] sm:$0xff] }
  0x51   :  { %v534_v53 = vmul.f32 1.6666666, %v998_v24  ;;  %v1257_v35 = vadd.f32 %v529_v37, %v1124_v31  ;;  %v1260_v11 = vadd.f32 %v530_v60, %v1135_v63  ;;  %v1262_v25 = vadd.f32 %v509_v44, %v505_v49  ;;  %v1577_v31 = vld [vmem:[#allocation11_spill] sm:$0xff]  ;;  %v1578_v63 = vld [vmem:[#allocation12_spill] sm:$0xff]  ;;  %v1582_v44 = vld [vmem:[#allocation13_spill] sm:$0xff] }
  0x52   :  { %v537_v3 = vsub.f32 1.0, %v533_v19  ;;  %v1264_v4 = vadd.f32 %v510_v9, %v506_v40  ;;  %v1266_v43 = vadd.f32 %v417_v5, %v413_v17  ;;  %v547_v23 = vsub.f32 1.0, %v1248_v8 }
  0x53   :  { %v535_v28 = vmul.f32 %v1096_v50, %v1108_v57  ;;  %v1271_v42 = vadd.f32 %v418_v33, %v414_v21  ;;  %v548_v24 = vsub.f32 1.0, %v1253_v18  ;;  %vm97_vm2 = vcmp.ge.f32.partialorder %v1577_v31, 0.2 }
  0x54   :  { %vm98_vm3 = vcmp.ge.f32.partialorder %v1578_v63, 0.2  ;;  %v545_v7 = vmul.f32 %v533_v19, %v409_v38  ;;  %v546_v32 = vmul.f32 %v534_v53, %v410_v13  ;;  %v536_v46 = vmul.f32 %v1099_v51, %v1113_v59 }
  0x55   :  { %v538_v26 = vsub.f32 1.0, %v534_v53  ;;  %v539_v16 = vmul.f32 %v537_v3, %v409_v38  ;;  %v1579_v39 = vmov 0.0   ;;  %v265_v50 = vmul.f32 5.0, %v1577_v31 }
  0x56   :  { %v774_v41 = vsel %vm97_vm2, 1.0, %v1579_v39  ;;  %v775_v37 = vsel %vm98_vm3, 1.0, %v1579_v39  ;;  %v549_v57 = vmul.f32 %v547_v23, %v1266_v43  ;;  %v515_v56 = vmul.f32 %v1205_v55, %v1212_v30 }
  0x57   :  { %v517_v52 = vsub.f32 1.0, %v1580_v10  ;;  %v161_v58 = vsub.f32 %v1138_v0, %v774_v41  ;;  %v550_v29 = vmul.f32 %v548_v24, %v1271_v42  ;;  %v516_v51 = vmul.f32 %v1208_v15, %v380_v45  ;;  %v1581_v0 = vld [vmem:[#allocation16_spill] sm:$0xff] }
  0x58   :  { %v162_v59 = vsub.f32 %v1153_v6, %v775_v37  ;;  %v266_v20 = vmul.f32 5.0, %v1578_v63  ;;  %v267_v27 = vmul.f32 %v1196_v54, %v1182_v47  ;;  %v269_v60 = vsub.f32 1.0, %v265_v50 }
  0x59   :  { %v1293_v49 = vmul.f32 2.5, %v1141_v1  ;;  %v1296_v55 = vmul.f32 2.5, %v1144_v2  ;;  %v540_v30 = vmul.f32 %v538_v26, %v410_v13  ;;  %v518_v40 = vsub.f32 1.0, %v1581_v0 }
  0x5a   :  { %v268_v15 = vmul.f32 %v1200_v14, %v1189_v48  ;;  %v270_v45 = vsub.f32 1.0, %v266_v20  ;;  %v551_v6 = vadd.f32 %v549_v57, %v545_v7  ;;  %v519_v9 = vmul.f32 %v517_v52, %v1582_v44  ;;  %v1583_v57 = vld [vmem:[#allocation15_spill] sm:$0xff] }
  0x5b   :  { %v271_v17 = vmul.f32 %v269_v60, %v161_v58  ;;  %v1303_v47 = vmul.f32 1.6666666, %v1128_v61  ;;  %v425_v5 = vsub.f32 1.0, %v1293_v49  ;;  %v426_v21 = vsub.f32 1.0, %v1296_v55 }
  0x5c   :  { %v272_v54 = vmul.f32 %v270_v45, %v162_v59  ;;  %v1308_v33 = vmul.f32 1.6666666, %v1131_v62  ;;  %vm103_vm4 = vcmp.ge.f32.partialorder %v1577_v31, 0.4  ;;  %vm104_vm5 = vcmp.ge.f32.partialorder %v1578_v63, 0.4 }
  0x5d   :  { %v273_v19 = vadd.f32 %v271_v17, %v267_v27  ;;  %v1313_v48 = vadd.f32 -0.2, %v1577_v31  ;;  %v1316_v61 = vsel %vm103_vm4, 1.0, %v1579_v39  ;;  %v1319_v13 = vsel %vm104_vm5, 1.0, %v1579_v39 }
  0x5e   :  { %v274_v38 = vadd.f32 %v272_v54, %v268_v15  ;;  %v1322_v53 = vadd.f32 -0.2, %v1578_v63  ;;  %v552_v62 = vadd.f32 %v550_v29, %v546_v32  ;;  %v541_v23 = vadd.f32 %v539_v16, %v535_v28 }
  0x5f   :  { %v423_v24 = vmul.f32 %v1226_v12, %v1223_v34  ;;  %v424_v7 = vmul.f32 %v1229_v36, %v1234_v22  ;;  %v542_v26 = vadd.f32 %v540_v30, %v536_v46  ;;  %v520_v10 = vmul.f32 %v518_v40, %v1583_v57 }
  0x60   :  { %v427_v52 = vmul.f32 %v425_v5, %v273_v19  ;;  %v428_v27 = vmul.f32 %v426_v21, %v274_v38  ;;  %v1330_v0 = vsub.f32 %v774_v41, %v1316_v61  ;;  %v1333_v15 = vsub.f32 %v775_v37, %v1319_v13 }
  0x61   :  { %v1336_v28 = vmul.f32 5.0, %v1313_v48  ;;  %v1339_v34 = vmul.f32 5.0, %v1322_v53  ;;  %v521_v36 = vadd.f32 %v519_v9, %v515_v56  ;;  %v557_v22 = vsub.f32 1.0, %v1303_v47 }
  0x62   :  { %v558_v32 = vsub.f32 1.0, %v1308_v33  ;;  %v429_v46 = vadd.f32 %v427_v52, %v423_v24  ;;  %v430_v16 = vadd.f32 %v428_v27, %v424_v7  ;;  %v279_v29 = vmul.f32 %v265_v50, %v161_v58 }
  0x63   :  { %v281_v41 = vsub.f32 1.0, %v1336_v28  ;;  %v282_v37 = vsub.f32 1.0, %v1339_v34  ;;  %v280_v30 = vmul.f32 %v266_v20, %v162_v59  ;;  %v1348_v40 = vmul.f32 2.5, %v1577_v31 }
  0x64   :  { %v1351_v45 = vmul.f32 2.5, %v1578_v63  ;;  %v522_v56 = vadd.f32 %v520_v10, %v516_v51  ;;  %v555_v50 = vmul.f32 %v1248_v8, %v1266_v43  ;;  %v556_v58 = vmul.f32 %v1253_v18, %v1271_v42 }
  0x65   :  { %v283_v44 = vmul.f32 %v281_v41, %v1330_v0  ;;  %v284_v9 = vmul.f32 %v282_v37, %v1333_v15  ;;  %v559_v51 = vmul.f32 %v557_v22, %v429_v46  ;;  %v560_v21 = vmul.f32 %v558_v32, %v430_v16 }
  0x66   :  { %v435_v24 = vsub.f32 1.0, %v1348_v40  ;;  %v434_v8 = vmul.f32 %v1296_v55, %v274_v38  ;;  %v1370_v43 = vmul.f32 1.6666666, %v1141_v1  ;;  %v1373_v18 = vmul.f32 1.6666666, %v1144_v2 }
  0x67   :  { %vm109_vm6 = vcmp.ge.f32.partialorder %v1577_v31, 0.6  ;;  %vm110_vm7 = vcmp.ge.f32.partialorder %v1578_v63, 0.6  ;;  %v562_v7 = vadd.f32 %v560_v21, %v556_v58  ;;  %v565_v57 = vmul.f32 %v1303_v47, %v429_v46 }
  0x68   :  { %v666_v3 = vpop.permute.xlu2 %665  ;;  %v778_v1 = vsel %vm109_vm6, 1.0, %v1579_v39  ;;  %v779_v2 = vsel %vm110_vm7, 1.0, %v1579_v39  ;;  %v567_v38 = vsub.f32 1.0, %v1370_v43  ;;  %v568_v10 = vsub.f32 1.0, %v1373_v18 }
  0x69   :  { %v1341_v12 = vmul.f32 %v666_v3, %v551_v6  ;;  %v1353_v6 = vmul.f32 %v666_v3, %v552_v62  ;;  %v285_v62 = vadd.f32 %v283_v44, %v279_v29  ;;  %v286_v3 = vadd.f32 %v284_v9, %v280_v30 }
  0x6a   :  { %v1384_v52 = vadd.f32 -0.4, %v1577_v31  ;;  %v1387_v27 = vadd.f32 -0.4, %v1578_v63  ;;  %v165_v32 = vsub.f32 %v1316_v61, %v778_v1  ;;  %v166_v46 = vsub.f32 %v1319_v13, %v779_v2 }
  0x6b   :  { %v437_v55 = vmul.f32 %v435_v24, %v285_v62  ;;  %v1394_v30 = vmul.f32 2.5, %v1313_v48  ;;  %v292_v61 = vmul.f32 %v1339_v34, %v1333_v15  ;;  %v1408_v34 = vmul.f32 1.6666666, %v1577_v31 }
  0x6c   :  { %v290_v41 = vmul.f32 5.0, %v1387_v27  ;;  %vm115_vm8 = vcmp.ge.f32.partialorder %v1577_v31, 0.8  ;;  %vm116_vm9 = vcmp.ge.f32.partialorder %v1578_v63, 0.8  ;;  %vm121_vm10 = vcmp.ge.f32.partialorder %v1577_v31, 1.0 }
  0x6d   :  { %vm122_vm11 = vcmp.ge.f32.partialorder %v1578_v63, 1.0  ;;  %vm127_vm12 = vcmp.ge.f32.partialorder %v1577_v31, 1.2  ;;  %vm128_vm13 = vcmp.ge.f32.partialorder %v1578_v63, 1.2 }
  0x6e   :  { %v294_v13 = vsub.f32 1.0, %v290_v41  ;;  %vm133_vm14 = vcmp.ge.f32.partialorder %v1577_v31, 1.4  ;;  %vm134_vm15 = vcmp.ge.f32.partialorder %v1578_v63, 1.4 }
  0x72   :  { %v674_v22 = vpop.permute.xlu2 %673 }
  0x73   :  { %v677_v58 = vmul.f32 %v674_v22, %v562_v7 }
  0x7f   :  { %v650_v60 = vpop.permute.xlu1 %649 }
  0x80   :  { %v636_v14 = vpop.permute.xlu0 %635  ;;  %v652_v17 = vmul.f32 %v650_v60, %v1257_v35  ;;  %v653_v54 = vmul.f32 %v650_v60, %v1260_v11  ;;  %v436_v35 = vsub.f32 1.0, %v1351_v45  ;;  %v433_v11 = vmul.f32 %v1293_v49, %v273_v19 }
  0x81   :  { %v638_v59 = vmul.f32 %v636_v14, %v1262_v25  ;;  %v639_v20 = vmul.f32 %v636_v14, %v1264_v4  ;;  %v561_v14 = vadd.f32 %v559_v51, %v555_v50  ;;  %v566_v49 = vmul.f32 %v1308_v33, %v430_v16 }
  0x82   :  { %v438_v19 = vmul.f32 %v436_v35, %v286_v3  ;;  %v289_v16 = vmul.f32 5.0, %v1384_v52  ;;  %v439_v37 = vadd.f32 %v437_v55, %v433_v11  ;;  %v443_v35 = vmul.f32 %v1348_v40, %v285_v62 }
  0x83   :  { %v676_v50 = vmul.f32 %v674_v22, %v561_v14  ;;  %v780_v40 = vsel %vm115_vm8, 1.0, %v1579_v39  ;;  %v577_v55 = vsub.f32 1.0, %v1408_v34  ;;  %v1437_v22 = vmul.f32 2.5, %v1387_v27 }
  0x84   :  { %v440_v29 = vadd.f32 %v438_v19, %v434_v8  ;;  %v569_v21 = vmul.f32 %v567_v38, %v439_v37  ;;  %v167_v38 = vsub.f32 %v778_v1, %v780_v40 }
  0x86   :  { %v570_v24 = vmul.f32 %v568_v10, %v440_v29  ;;  %v571_v62 = vadd.f32 %v569_v21, %v565_v57 }
  0x88   :  { %v658_v42 = vpop.permute.xlu1 %657 }
  0x89   :  { %v642_v5 = vpop.permute.xlu0 %641  ;;  %v660_v60 = vmul.f32 %v658_v42, %v541_v23  ;;  %v661_v47 = vmul.f32 %v658_v42, %v542_v26  ;;  %v291_v23 = vmul.f32 %v1336_v28, %v1330_v0  ;;  %v293_v26 = vsub.f32 1.0, %v289_v16 }
  0x8a   :  { %v644_v25 = vmul.f32 %v642_v5, %v521_v36  ;;  %v645_v4 = vmul.f32 %v642_v5, %v522_v56  ;;  %v1397_v56 = vmul.f32 2.5, %v1322_v53  ;;  %v445_v5 = vsub.f32 1.0, %v1394_v30 }
  0x8b   :  { %v444_v0 = vmul.f32 %v1351_v45, %v286_v3  ;;  %v781_v45 = vsel %vm116_vm9, 1.0, %v1579_v39  ;;  %v572_v3 = vadd.f32 %v570_v24, %v566_v49  ;;  %v1421_v42 = vadd.f32 -0.6, %v1578_v63 }
  0x8c   :  { %v646_v36 = vadd.f32 %v644_v25, %v638_v59  ;;  %v647_v33 = vadd.f32 %v645_v4, %v639_v20  ;;  %v295_v59 = vmul.f32 %v293_v26, %v165_v32  ;;  %v296_v20 = vmul.f32 %v294_v13, %v166_v46 }
  0x8d   :  { %v446_v51 = vsub.f32 1.0, %v1397_v56  ;;  %v1418_v4 = vadd.f32 -0.6, %v1577_v31  ;;  %v168_v10 = vsub.f32 %v779_v2, %v781_v45  ;;  %v302_v57 = vmul.f32 5.0, %v1421_v42 }
  0x8e   :  { %v654_v44 = vadd.f32 %v652_v17, %v646_v36  ;;  %v655_v9 = vadd.f32 %v653_v54, %v647_v33  ;;  %v297_v28 = vadd.f32 %v295_v59, %v291_v23  ;;  %v298_v15 = vadd.f32 %v296_v20, %v292_v61 }
  0x8f   :  { %v1411_v17 = vmul.f32 1.6666666, %v1578_v63  ;;  %v1434_v33 = vmul.f32 2.5, %v1384_v52  ;;  %v303_v23 = vmul.f32 %v289_v16, %v165_v32  ;;  %v304_v61 = vmul.f32 %v290_v41, %v166_v46 }
  0x90   :  { %v662_v54 = vadd.f32 %v660_v60, %v654_v44  ;;  %v663_v11 = vadd.f32 %v661_v47, %v655_v9  ;;  %v447_v8 = vmul.f32 %v445_v5, %v297_v28  ;;  %v448_v25 = vmul.f32 %v446_v51, %v298_v15 }
  0x91   :  { %v578_v19 = vsub.f32 1.0, %v1411_v17  ;;  %v301_v60 = vmul.f32 5.0, %v1418_v4  ;;  %v682_v36 = vpop.permute.xlu1 %681  ;;  %v306_v1 = vsub.f32 1.0, %v302_v57  ;;  %v575_v2 = vmul.f32 %v1370_v43, %v439_v37 }
  0x92   :  { %v1423_v14 = vadd.f32 %v447_v8, %v443_v35  ;;  %v1425_v7 = vadd.f32 %v448_v25, %v444_v0  ;;  %v670_v49 = vadd.f32 %v1341_v12, %v662_v54  ;;  %v671_v47 = vadd.f32 %v1353_v6, %v663_v11  ;;  %v690_v35 = vpop.permute.xlu2 %689 }
  0x93   :  { %v305_v26 = vsub.f32 1.0, %v301_v60  ;;  %v576_v13 = vmul.f32 %v1373_v18, %v440_v29  ;;  %v684_v6 = vmul.f32 %v682_v36, %v571_v62  ;;  %v685_v9 = vmul.f32 %v682_v36, %v572_v3 }
  0x94   :  { %v579_v44 = vmul.f32 %v577_v55, %v1423_v14  ;;  %v580_v12 = vmul.f32 %v578_v19, %v1425_v7  ;;  %v308_v20 = vmul.f32 %v306_v1, %v168_v10  ;;  %v678_v5 = vadd.f32 %v676_v50, %v670_v49 }
  0x95   :  { %v307_v59 = vmul.f32 %v305_v26, %v167_v38  ;;  %v679_v51 = vadd.f32 %v677_v58, %v671_v47  ;;  %v455_v21 = vsub.f32 1.0, %v1434_v33  ;;  %v456_v32 = vsub.f32 1.0, %v1437_v22 }
  0x96   :  { %v310_v16 = vadd.f32 %v308_v20, %v304_v61  ;;  %v581_v43 = vadd.f32 %v579_v44, %v575_v2  ;;  %v582_v18 = vadd.f32 %v580_v12, %v576_v13  ;;  %v453_v41 = vmul.f32 %v1394_v30, %v297_v28 }
  0x97   :  { %v309_v46 = vadd.f32 %v307_v59, %v303_v23  ;;  %v454_v37 = vmul.f32 %v1397_v56, %v298_v15  ;;  %v583_v29 = vmul.f32 1.6666666, %v1313_v48  ;;  %v584_v50 = vmul.f32 1.6666666, %v1322_v53 }
  0x98   :  { %v782_v58 = vsel %vm121_vm10, 1.0, %v1579_v39  ;;  %v783_v24 = vsel %vm122_vm11, 1.0, %v1579_v39  ;;  %v458_v54 = vmul.f32 %v456_v32, %v310_v16  ;;  %v1454_v11 = vadd.f32 -0.8, %v1577_v31 }
  0x99   :  { %v457_v0 = vmul.f32 %v455_v21, %v309_v46  ;;  %v1457_v8 = vadd.f32 -0.8, %v1578_v63  ;;  %v686_v30 = vadd.f32 %v684_v6, %v678_v5  ;;  %v687_v28 = vadd.f32 %v685_v9, %v679_v51 }
  0x9a   :  { %v169_v56 = vsub.f32 %v780_v40, %v782_v58  ;;  %v170_v15 = vsub.f32 %v781_v45, %v783_v24  ;;  %v313_v48 = vmul.f32 5.0, %v1454_v11  ;;  %v692_v25 = vmul.f32 %v690_v35, %v581_v43 }
  0x9b   :  { %v314_v53 = vmul.f32 5.0, %v1457_v8  ;;  %v693_v62 = vmul.f32 %v690_v35, %v582_v18  ;;  %v587_v3 = vsub.f32 1.0, %v583_v29  ;;  %v588_v55 = vsub.f32 1.0, %v584_v50 }
  0x9c   :  { %v459_v19 = vadd.f32 %v457_v0, %v453_v41  ;;  %v460_v49 = vadd.f32 %v458_v54, %v454_v37  ;;  %v317_v47 = vsub.f32 1.0, %v313_v48  ;;  %v461_v23 = vmul.f32 2.5, %v1418_v4  ;;  %v698_v54 = vpop.permute.xlu0 %697 }
  0x9d   :  { %v318_v36 = vsub.f32 1.0, %v314_v53  ;;  %v462_v61 = vmul.f32 2.5, %v1421_v42  ;;  %v315_v26 = vmul.f32 %v301_v60, %v167_v38  ;;  %v316_v1 = vmul.f32 %v302_v57, %v168_v10 }
  0x9e   :  { %v319_v40 = vmul.f32 %v317_v47, %v169_v56  ;;  %v585_v2 = vmul.f32 %v1408_v34, %v1423_v14  ;;  %v586_v13 = vmul.f32 %v1411_v17, %v1425_v7  ;;  %v1469_v44 = vadd.f32 %v692_v25, %v686_v30 }
  0x9f   :  { %v320_v45 = vmul.f32 %v318_v36, %v170_v15  ;;  %v1471_v12 = vadd.f32 %v693_v62, %v687_v28  ;;  %v589_v6 = vmul.f32 %v587_v3, %v459_v19  ;;  %v590_v9 = vmul.f32 %v588_v55, %v460_v49 }
  0xa0   :  { %v465_v38 = vsub.f32 1.0, %v461_v23  ;;  %v466_v10 = vsub.f32 1.0, %v462_v61  ;;  %v784_v60 = vsel %vm127_vm12, 1.0, %v1579_v39  ;;  %v785_v57 = vsel %vm128_vm13, 1.0, %v1579_v39 }
  0xa1   :  { %v321_v34 = vadd.f32 %v319_v40, %v315_v26  ;;  %v322_v14 = vadd.f32 %v320_v45, %v316_v1  ;;  %v1476_v17 = vadd.f32 -1.0, %v1577_v31  ;;  %v1479_v7 = vadd.f32 -1.0, %v1578_v63 }
  0xa2   :  { %v463_v59 = vmul.f32 %v1434_v33, %v309_v46  ;;  %v464_v20 = vmul.f32 %v1437_v22, %v310_v16  ;;  %v1484_v5 = vmul.f32 1.6666666, %v1384_v52  ;;  %v1487_v51 = vmul.f32 1.6666666, %v1387_v27 }
  0xa3   :  { %v171_v21 = vsub.f32 %v782_v58, %v784_v60  ;;  %v172_v32 = vsub.f32 %v783_v24, %v785_v57  ;;  %v325_v43 = vmul.f32 5.0, %v1476_v17  ;;  %v326_v18 = vmul.f32 5.0, %v1479_v7 }
  0xa4   :  { %v591_v41 = vadd.f32 %v589_v6, %v585_v2  ;;  %v592_v37 = vadd.f32 %v590_v9, %v586_v13  ;;  %v595_v35 = vmul.f32 %v583_v29, %v459_v19  ;;  %v596_v0 = vmul.f32 %v584_v50, %v460_v49 }
  0xa5   :  { %v467_v33 = vmul.f32 %v465_v38, %v321_v34  ;;  %v468_v46 = vmul.f32 %v466_v10, %v322_v14  ;;  %v329_v22 = vsub.f32 1.0, %v325_v43  ;;  %v330_v16 = vsub.f32 1.0, %v326_v18 }
  0xa6   :  { %v597_v52 = vsub.f32 1.0, %v1484_v5  ;;  %v598_v27 = vsub.f32 1.0, %v1487_v51  ;;  %v327_v30 = vmul.f32 %v313_v48, %v169_v56  ;;  %v328_v58 = vmul.f32 %v314_v53, %v170_v15 }
  0xa7   :  { %v331_v24 = vmul.f32 %v329_v22, %v171_v21  ;;  %v332_v28 = vmul.f32 %v330_v16, %v172_v32  ;;  %v471_v25 = vmul.f32 2.5, %v1454_v11  ;;  %v472_v62 = vmul.f32 2.5, %v1457_v8 }
  0xa8   :  { %v1495_v3 = vmul.f32 %v698_v54, %v591_v41  ;;  %v1497_v29 = vmul.f32 %v698_v54, %v592_v37  ;;  %v469_v50 = vadd.f32 %v467_v33, %v463_v59  ;;  %v470_v55 = vadd.f32 %v468_v46, %v464_v20 }
  0xa9   :  { %v473_v19 = vmul.f32 %v461_v23, %v321_v34  ;;  %v474_v49 = vmul.f32 %v462_v61, %v322_v14  ;;  %v1502_v56 = vsel %vm133_vm14, 1.0, %v1579_v39  ;;  %v1505_v15 = vsel %vm134_vm15, 1.0, %v1579_v39 }
  0xaa   :  { %v816_v48 = vadd.f32 -1.2, %v1577_v31  ;;  %v817_v53 = vadd.f32 -1.2, %v1578_v63  ;;  %v333_v47 = vadd.f32 %v331_v24, %v327_v30  ;;  %v334_v36 = vadd.f32 %v332_v28, %v328_v58  ;;  %v851_v24 = vld [vmem:[#allocation2] sm:$0x1f] }
  0xab   :  { %v475_v26 = vsub.f32 1.0, %v471_v25  ;;  %v476_v1 = vsub.f32 1.0, %v472_v62  ;;  %v1510_v40 = vsub.f32 %v784_v60, %v1502_v56  ;;  %v1513_v23 = vsub.f32 %v785_v57, %v1505_v15 }
  0xac   :  { %v337_v61 = vmul.f32 5.0, %v816_v48  ;;  %v338_v45 = vmul.f32 5.0, %v817_v53  ;;  %v599_v2 = vmul.f32 %v597_v52, %v469_v50  ;;  %v600_v13 = vmul.f32 %v598_v27, %v470_v55  ;;  %v706_v27 = vpop.permute.xlu1 %705 }
  0xad   :  { %v339_v6 = vmul.f32 %v325_v43, %v171_v21  ;;  %v340_v9 = vmul.f32 %v326_v18, %v172_v32  ;;  %v1516_v63 = vmul.f32 2.5, %v1476_v17  ;;  %v1519_v10 = vmul.f32 2.5, %v1479_v7 }
  0xae   :  { %v341_v38 = vsub.f32 1.0, %v337_v61  ;;  %v342_v31 = vsub.f32 1.0, %v338_v45  ;;  %v477_v34 = vmul.f32 %v475_v26, %v333_v47  ;;  %v478_v60 = vmul.f32 %v476_v1, %v334_v36 }
  0xaf   :  { %v603_v14 = vmul.f32 1.6666666, %v1418_v4  ;;  %v604_v57 = vmul.f32 1.6666666, %v1421_v42  ;;  %v485_v21 = vsub.f32 1.0, %v1516_v63  ;;  %v486_v32 = vsub.f32 1.0, %v1519_v10 }
  0xb0   :  { %v343_v59 = vmul.f32 %v341_v38, %v1510_v40  ;;  %v344_v20 = vmul.f32 %v342_v31, %v1513_v23  ;;  %v601_v43 = vadd.f32 %v599_v2, %v595_v35  ;;  %v602_v18 = vadd.f32 %v600_v13, %v596_v0  ;;  %v852_v35 = vld [vmem:[#allocation2 + $0x8] sm:$0x1f] }
  0xb1   :  { %v1528_v41 = vmul.f32 1.6666666, %v1454_v11  ;;  %v1531_v37 = vmul.f32 1.6666666, %v1457_v8  ;;  %v483_v33 = vmul.f32 %v471_v25, %v333_v47  ;;  %v484_v42 = vmul.f32 %v472_v62, %v334_v36 }
  0xb2   :  { %v345_v54 = vadd.f32 %v343_v59, %v339_v6  ;;  %v346_v4 = vadd.f32 %v344_v20, %v340_v9  ;;  %v479_v46 = vadd.f32 %v477_v34, %v473_v19  ;;  %v480_v22 = vadd.f32 %v478_v60, %v474_v49 }
  0xb3   :  { %v607_v16 = vsub.f32 1.0, %v603_v14  ;;  %v608_v52 = vsub.f32 1.0, %v604_v57  ;;  %vm139_vm0 = vcmp.ge.f32.partialorder %v851_v24, 1.6  ;;  %vm140_vm1 = vcmp.ge.f32.partialorder %v852_v35, 1.6 }
  0xb4   :  { %v487_v30 = vmul.f32 %v485_v21, %v345_v54  ;;  %v488_v58 = vmul.f32 %v486_v32, %v346_v4  ;;  %v605_v11 = vmul.f32 %v1484_v5, %v469_v50  ;;  %v606_v8 = vmul.f32 %v1487_v51, %v470_v55 }
  0xb5   :  { %v617_v0 = vsub.f32 1.0, %v1528_v41  ;;  %v618_v28 = vsub.f32 1.0, %v1531_v37  ;;  %v788_v19 = vsel %vm139_vm0, 1.0, %v1579_v39  ;;  %v789_v49 = vsel %vm140_vm1, 1.0, %v1579_v39 }
  0xb6   :  { %v489_v25 = vadd.f32 %v487_v30, %v483_v33  ;;  %v490_v62 = vadd.f32 %v488_v58, %v484_v42  ;;  %v708_v47 = vmul.f32 %v706_v27, %v601_v43  ;;  %v709_v36 = vmul.f32 %v706_v27, %v602_v18 }
  0xb7   :  { %v818_v26 = vadd.f32 -1.4, %v851_v24  ;;  %v819_v1 = vadd.f32 -1.4, %v852_v35  ;;  %v609_v2 = vmul.f32 %v607_v16, %v479_v46  ;;  %v610_v13 = vmul.f32 %v608_v52, %v480_v22 }
  0xb8   :  { %v491_v6 = vmul.f32 2.5, %v816_v48  ;;  %v492_v5 = vmul.f32 2.5, %v817_v53  ;;  %v175_v51 = vsub.f32 %v1502_v56, %v788_v19  ;;  %v176_v50 = vsub.f32 %v1505_v15, %v789_v49  ;;  %v714_v48 = vpop.permute.xlu2 %713 }
  0xb9   :  { %v349_v55 = vmul.f32 5.0, %v818_v26  ;;  %v350_v9 = vmul.f32 5.0, %v819_v1  ;;  %v615_v38 = vmul.f32 %v603_v14, %v479_v46  ;;  %v616_v31 = vmul.f32 %v604_v57, %v480_v22 }
  0xba   :  { %v619_v34 = vmul.f32 %v617_v0, %v489_v25  ;;  %v620_v60 = vmul.f32 %v618_v28, %v490_v62  ;;  %v351_v39 = vmul.f32 %v337_v61, %v1510_v40  ;;  %v352_v59 = vmul.f32 %v338_v45, %v1513_v23  ;;  %v722_v45 = vpop.permute.xlu1 %721 }
  0xbb   :  { %v353_v20 = vsub.f32 1.0, %v349_v55  ;;  %v354_v21 = vsub.f32 1.0, %v350_v9  ;;  %v611_v32 = vadd.f32 %v609_v2, %v605_v11  ;;  %v612_v43 = vadd.f32 %v610_v13, %v606_v8 }
  0xbc   :  { %v495_v53 = vsub.f32 1.0, %v491_v6  ;;  %v496_v18 = vsub.f32 1.0, %v492_v5  ;;  %v623_v15 = vmul.f32 1.6666666, %v1476_v17  ;;  %v624_v14 = vmul.f32 1.6666666, %v1479_v7 }
  0xbd   :  { %v355_v56 = vmul.f32 %v353_v20, %v175_v51  ;;  %v356_v33 = vmul.f32 %v354_v21, %v176_v50  ;;  %v702_v57 = vadd.f32 %v1495_v3, %v1469_v44  ;;  %v703_v40 = vadd.f32 %v1497_v29, %v1471_v12 }
  0xbe   :  { %v621_v23 = vadd.f32 %v619_v34, %v615_v38  ;;  %v622_v61 = vadd.f32 %v620_v60, %v616_v31  ;;  %v493_v22 = vmul.f32 %v1516_v63, %v345_v54  ;;  %v494_v16 = vmul.f32 %v1519_v10, %v346_v4 }
  0xbf   :  { %v357_v42 = vadd.f32 %v355_v56, %v351_v39  ;;  %v358_v46 = vadd.f32 %v356_v33, %v352_v59  ;;  %v710_v52 = vadd.f32 %v708_v47, %v702_v57  ;;  %v711_v27 = vadd.f32 %v709_v36, %v703_v40 }
  0xc0   :  { %v716_v17 = vmul.f32 %v714_v48, %v611_v32  ;;  %v717_v30 = vmul.f32 %v714_v48, %v612_v43  ;;  %v627_v24 = vsub.f32 1.0, %v623_v15  ;;  %v628_v44 = vsub.f32 1.0, %v624_v14  ;;  %v730_v4 = vpop.permute.xlu2 %729 }
  0xc1   :  { %v497_v7 = vmul.f32 %v495_v53, %v357_v42  ;;  %v498_v58 = vmul.f32 %v496_v18, %v358_v46  ;;  %v724_v3 = vmul.f32 %v722_v45, %v621_v23  ;;  %v725_v35 = vmul.f32 %v722_v45, %v622_v61 }
  0xc2   :  { %v625_v11 = vmul.f32 %v1528_v41, %v489_v25  ;;  %v626_v8 = vmul.f32 %v1531_v37, %v490_v62  ;;  %v718_v0 = vadd.f32 %v716_v17, %v710_v52  ;;  %v719_v63 = vadd.f32 %v717_v30, %v711_v27 }
  0xc3   :  { %v499_v12 = vadd.f32 %v497_v7, %v493_v22  ;;  %v500_v29 = vadd.f32 %v498_v58, %v494_v16 }
  0xc4   :  { %v726_v28 = vadd.f32 %v724_v3, %v718_v0  ;;  %v727_v19 = vadd.f32 %v725_v35, %v719_v63 }
  0xc5   :  { %v629_v54 = vmul.f32 %v627_v24, %v499_v12  ;;  %v630_v10 = vmul.f32 %v628_v44, %v500_v29 }
  0xc7   :  { %v631_v49 = vadd.f32 %v629_v54, %v625_v11  ;;  %v632_v47 = vadd.f32 %v630_v10, %v626_v8 }
  0xc9   :  { %v732_v36 = vmul.f32 %v730_v4, %v631_v49  ;;  %v733_v26 = vmul.f32 %v730_v4, %v632_v47 }
  0xcb   :  { %v734_v41 = vadd.f32 %v732_v36, %v726_v28  ;;  %v735_v25 = vadd.f32 %v733_v26, %v727_v19 }
  0xcd   :  { %736 = vst [vmem:[#allocation7] sm:$0x1f] %v734_v41 }
  0xce   :  { %737 = vst [vmem:[#allocation7 + $0x8] sm:$0x1f] %v735_v25 }
  0xcf   :  { %748 = dma.vmem_to_hbm [thread:$0]  %s744_s1, 256, %s746_s21, [#allocation4]  }
  0xd0   :  { %929 = dma.done.wait [#allocation4], 256  }
  0xd1   :  { %930 = vsyncadd [#allocation4], 4294967040 }
  0xd2   :  { %753 = vsyncpa [#allocation3], 1 }
  0xd3   :  { %754 = vsyncpa [#allocation6], 1 }
  0xd4   :  { %755 = vsyncpa [#allocation4], 1 }

</bundles_post_ra>
